<compile_context>
chip_gen: v5e
topology: v5e:2x2
jax: 0.10.0
libtpu: 0.0.40
codegen_flags: <defaults>
</compile_context>

<pallas_src>
import math
import functools

import jax
import jax.numpy as jnp
from jax import lax
from jax.experimental import pallas as pl
from jax.experimental.pallas import tpu as pltpu

_VMEM_LIMIT = 32 * 1024 * 1024          # explicit scoped-VMEM budget (safe on v5e/v6e/v7x)
_TM, _TN, _TK = 256, 256, 512           # target tile sizes (256-multiples for v6e/v7x MXU)


def _pick_tile(dim, target, align):
    """Largest tile <= target that divides `dim` and is a multiple of `align`;
    falls back to the full dim (always legal) at small shapes."""
    if dim <= target:
        return dim
    t = (target // align) * align
    while t >= align:
        if dim % t == 0:
            return t
        t -= align
    return dim


def _gelu(y):
    # exact (erf-based) GELU, matching torch.nn.GELU default; kept in f32
    return 0.5 * y * (1.0 + lax.erf(y * jnp.float32(1.0 / math.sqrt(2.0))))


def _layernorm(x, g, b, eps=1e-5):
    mu = jnp.mean(x, axis=-1, keepdims=True)
    var = jnp.mean((x - mu) ** 2, axis=-1, keepdims=True)
    return (x - mu) * lax.rsqrt(var + eps) * g + b


# ----------------------------------------------------------------------------
# Kernels
# ----------------------------------------------------------------------------
def _linear_bias_kernel(x_ref, w_ref, b_ref, o_ref, acc_ref):
    """Tiled matmul with f32 accumulator over the K grid axis; bias in finalize."""
    @pl.when(pl.program_id(2) == 0)
    def _():
        acc_ref[...] = jnp.zeros_like(acc_ref)

    acc_ref[...] += jnp.dot(
        x_ref[...].astype(jnp.bfloat16), w_ref[...],
        preferred_element_type=jnp.float32)

    @pl.when(pl.program_id(2) == pl.num_programs(2) - 1)
    def _():
        o_ref[...] = acc_ref[...] + b_ref[...]


def _ln_matmul_kernel(x_ref, g_ref, b_ref, w_ref, xn_ref, y_ref):
    """Fused LayerNorm (f32 stats) + matmul; outputs both LN(x) and LN(x) @ W."""
    xn = _layernorm(x_ref[...], g_ref[...], b_ref[...])
    xn_ref[...] = xn
    y_ref[...] = jnp.dot(xn.astype(jnp.bfloat16), w_ref[...],
                         preferred_element_type=jnp.float32)


def _ln_ffn_kernel(x_ref, g_ref, b_ref, w1_ref, w2_ref, o_ref):
    """Fused LayerNorm + (GELU(x@w1) @ w2) + residual; 4E-wide h stays in VMEM."""
    x = x_ref[...]
    xn = _layernorm(x, g_ref[...], b_ref[...])
    h = jnp.dot(xn.astype(jnp.bfloat16), w1_ref[...],
                preferred_element_type=jnp.float32)
    h = _gelu(h)
    y = jnp.dot(h.astype(jnp.bfloat16), w2_ref[...],
                preferred_element_type=jnp.float32)
    o_ref[...] = x + y


def _mha_body(q, k, v, wfc_ref, res, n_heads, causal):
    """Shared multi-head attention body.

    q: (Tq, C) f32, k/v: (Tk, C) f32, wfc_ref: (H, Dh, C) bf16 ref, res: (Tq, C) f32.
    Per head: scores via dot_general (no k.T), in-kernel causal mask via iota,
    approx-reciprocal softmax, then the fc_out projection is applied per head
    (wfc row-block) and accumulated directly onto the residual -> single
    lane-dense (Tq, C) result.
    """
    Tq, C = q.shape
    Tk = k.shape[0]
    Dh = C // n_heads
    scale = jnp.float32(1.0 / math.sqrt(Dh))

    if causal:
        row = lax.broadcasted_iota(jnp.int32, (Tq, Tk), 0)
        col = lax.broadcasted_iota(jnp.int32, (Tq, Tk), 1)
        neg = jnp.where(row >= col, 0.0, -1e30).astype(jnp.float32)

    acc = res
    for h in range(n_heads):
        sl = slice(h * Dh, (h + 1) * Dh)
        s = lax.dot_general(
            q[:, sl].astype(jnp.bfloat16), k[:, sl].astype(jnp.bfloat16),
            (((1,), (1,)), ((), ())),
            preferred_element_type=jnp.float32) * scale
        if causal:
            s = s + neg
        s = s - jnp.max(s, axis=-1, keepdims=True)
        p = jnp.exp(s)
        p = p * pl.reciprocal(jnp.sum(p, axis=-1, keepdims=True), approx=True)
        o_h = jnp.dot(p.astype(jnp.bfloat16), v[:, sl].astype(jnp.bfloat16),
                      preferred_element_type=jnp.float32)
        acc = acc + jnp.dot(o_h.astype(jnp.bfloat16), wfc_ref[h],
                            preferred_element_type=jnp.float32)
    return acc


def _self_attn_kernel(qkv_ref, wfc_ref, res_ref, o_ref, *, n_heads, causal):
    qkv = qkv_ref[0]                       # (T, 3C) f32
    C = qkv.shape[-1] // 3
    o_ref[0] = _mha_body(qkv[:, :C], qkv[:, C:2 * C], qkv[:, 2 * C:],
                         wfc_ref, res_ref[0], n_heads, causal)


def _cross_attn_kernel(x_ref, enc_ref, qg_ref, qb_ref, kg_ref, kb_ref,
                       wfc_ref, o_ref, *, n_heads):
    x = x_ref[0]                           # (Tq, C) f32 (residual base + q pre-LN)
    qn = _layernorm(x, qg_ref[...], qb_ref[...])          # normraw(x)
    kn = _layernorm(enc_ref[0], kg_ref[...], kb_ref[...])  # normenc(enc_out), k == v
    o_ref[0] = _mha_body(qn, kn, kn, wfc_ref, x, n_heads, causal=False)


# ----------------------------------------------------------------------------
# Pallas wrappers
# ----------------------------------------------------------------------------
def linear_bias(x2d, w_bf16, bias_f32):
    """Tiled (M, N, K) matmul with bias for the vocab projection."""
    M, K = x2d.shape
    N = w_bf16.shape[1]
    tm = _pick_tile(M, _TM, 8)
    tn = _pick_tile(N, _TN, 128)
    tk = _pick_tile(K, _TK, 128)
    return pl.pallas_call(
        _linear_bias_kernel,
        out_shape=jax.ShapeDtypeStruct((M, N), jnp.float32),
        grid_spec=pltpu.PrefetchScalarGridSpec(
            num_scalar_prefetch=0,
            grid=(M // tm, N // tn, K // tk),
            in_specs=[
                pl.BlockSpec((tm, tk), lambda i, j, k: (i, k)),
                pl.BlockSpec((tk, tn), lambda i, j, k: (k, j)),
                pl.BlockSpec((1, tn), lambda i, j, k: (0, j)),
            ],
            out_specs=pl.BlockSpec((tm, tn), lambda i, j, k: (i, j)),
            scratch_shapes=[pltpu.VMEM((tm, tn), jnp.float32)]),
        compiler_params=pltpu.CompilerParams(
            dimension_semantics=("parallel", "parallel", "arbitrary"),
            vmem_limit_bytes=_VMEM_LIMIT),
    )(x2d, w_bf16, bias_f32.reshape(1, N))


def ln_matmul(x2d, gamma, beta, w_bf16):
    """LayerNorm fused into the matmul prologue; returns (LN(x), LN(x) @ W)."""
    M, K = x2d.shape
    N = w_bf16.shape[1]
    tm = _pick_tile(M, _TM, 8)
    return pl.pallas_call(
        _ln_matmul_kernel,
        out_shape=(jax.ShapeDtypeStruct((M, K), jnp.float32),
                   jax.ShapeDtypeStruct((M, N), jnp.float32)),
        grid=(M // tm,),
        in_specs=[
            pl.BlockSpec((tm, K), lambda i: (i, 0)),
            pl.BlockSpec((1, K), lambda i: (0, 0)),
            pl.BlockSpec((1, K), lambda i: (0, 0)),
            pl.BlockSpec((K, N), lambda i: (0, 0)),
        ],
        out_specs=(pl.BlockSpec((tm, K), lambda i: (i, 0)),
                   pl.BlockSpec((tm, N), lambda i: (i, 0))),
        compiler_params=pltpu.CompilerParams(
            dimension_semantics=("parallel",), vmem_limit_bytes=_VMEM_LIMIT),
    )(x2d, gamma.reshape(1, K), beta.reshape(1, K), w_bf16)


def ln_ffn_residual(x2d, gamma, beta, w1_bf16, w2_bf16):
    """out = x + GELU(LN(x) @ w1) @ w2, one kernel, tiled over rows."""
    M, C = x2d.shape
    Hd = w1_bf16.shape[1]
    tm = _pick_tile(M, _TM, 8)
    return pl.pallas_call(
        _ln_ffn_kernel,
        out_shape=jax.ShapeDtypeStruct((M, C), jnp.float32),
        grid=(M // tm,),
        in_specs=[
            pl.BlockSpec((tm, C), lambda i: (i, 0)),
            pl.BlockSpec((1, C), lambda i: (0, 0)),
            pl.BlockSpec((1, C), lambda i: (0, 0)),
            pl.BlockSpec((C, Hd), lambda i: (0, 0)),
            pl.BlockSpec((Hd, C), lambda i: (0, 0)),
        ],
        out_specs=pl.BlockSpec((tm, C), lambda i: (i, 0)),
        compiler_params=pltpu.CompilerParams(
            dimension_semantics=("parallel",), vmem_limit_bytes=_VMEM_LIMIT),
    )(x2d, gamma.reshape(1, C), beta.reshape(1, C), w1_bf16, w2_bf16)


def self_attention(qkv_btc, res_btc, wfc_bf16, n_heads, causal):
    """out = res + fc_out(MHA(q, k, v)) with q/k/v sliced from the qkv slab."""
    B, T, C3 = qkv_btc.shape
    C = C3 // 3
    Dh = C // n_heads
    wfc_h = wfc_bf16.reshape(n_heads, Dh, C)     # row-blocks of fc_out per head
    return pl.pallas_call(
        functools.partial(_self_attn_kernel, n_heads=n_heads, causal=causal),
        out_shape=jax.ShapeDtypeStruct((B, T, C), jnp.float32),
        grid=(B,),
        in_specs=[
            pl.BlockSpec((1, T, C3), lambda b: (b, 0, 0)),
            pl.BlockSpec((n_heads, Dh, C), lambda b: (0, 0, 0)),
            pl.BlockSpec((1, T, C), lambda b: (b, 0, 0)),
        ],
        out_specs=pl.BlockSpec((1, T, C), lambda b: (b, 0, 0)),
        compiler_params=pltpu.CompilerParams(
            dimension_semantics=("parallel",), vmem_limit_bytes=_VMEM_LIMIT),
    )(qkv_btc, wfc_h, res_btc)


def cross_attention(x_btc, enc_btc, qg, qb, kg, kb, wfc_bf16, n_heads):
    """out = x + fc_out(MHA(normraw(x), normenc(enc), normenc(enc))); LNs fused."""
    B, Tq, C = x_btc.shape
    Tk = enc_btc.shape[1]
    Dh = C // n_heads
    wfc_h = wfc_bf16.reshape(n_heads, Dh, C)
    return pl.pallas_call(
        functools.partial(_cross_attn_kernel, n_heads=n_heads),
        out_shape=jax.ShapeDtypeStruct((B, Tq, C), jnp.float32),
        grid=(B,),
        in_specs=[
            pl.BlockSpec((1, Tq, C), lambda b: (b, 0, 0)),
            pl.BlockSpec((1, Tk, C), lambda b: (b, 0, 0)),
            pl.BlockSpec((1, C), lambda b: (0, 0)),
            pl.BlockSpec((1, C), lambda b: (0, 0)),
            pl.BlockSpec((1, C), lambda b: (0, 0)),
            pl.BlockSpec((1, C), lambda b: (0, 0)),
            pl.BlockSpec((n_heads, Dh, C), lambda b: (0, 0, 0)),
        ],
        out_specs=pl.BlockSpec((1, Tq, C), lambda b: (b, 0, 0)),
        compiler_params=pltpu.CompilerParams(
            dimension_semantics=("parallel",), vmem_limit_bytes=_VMEM_LIMIT),
    )(x_btc, enc_btc, qg.reshape(1, C), qb.reshape(1, C),
      kg.reshape(1, C), kb.reshape(1, C), wfc_h)


# ----------------------------------------------------------------------------
# Model forward (thin JAX glue; all heavy work inside the fused kernels)
# ----------------------------------------------------------------------------
def encoder_block(x, p, n_heads):
    B, T, C = x.shape
    xn2d, qkv2d = ln_matmul(x.reshape(B * T, C), p["norm1_g"], p["norm1_b"], p["qkv_w"])
    xn = xn2d.reshape(B, T, C)               # residual base == norm1(x), per reference
    qkv = qkv2d.reshape(B, T, 3 * C)
    x = self_attention(qkv, xn, p["mha_fc_w"], n_heads, causal=False)
    x2d = ln_ffn_residual(x.reshape(B * T, C), p["norm2_g"], p["norm2_b"],
                          p["ffwd"]["w1"], p["ffwd"]["w2"])
    return x2d.reshape(B, T, C)


def decoder_block(x, enc_out, p, n_heads):
    B, T, C = x.shape
    xn2d, qkv2d = ln_matmul(x.reshape(B * T, C), p["norm1_g"], p["norm1_b"], p["qkv_w"])
    xn = xn2d.reshape(B, T, C)
    qkv = qkv2d.reshape(B, T, 3 * C)
    x = self_attention(qkv, xn, p["mmha_fc_w"], n_heads, causal=True)
    x = cross_attention(x, enc_out, p["normraw_g"], p["normraw_b"],
                        p["normenc_g"], p["normenc_b"], p["mha_fc_w"], n_heads)
    x2d = ln_ffn_residual(x.reshape(B * T, C), p["norm3_g"], p["norm3_b"],
                          p["ffwd"]["w1"], p["ffwd"]["w2"])
    return x2d.reshape(B, T, C)


def sinusoid_encoding(hidden_dim, max_len):
    position = jnp.arange(max_len, dtype=jnp.float32)[:, None]
    div_term = jnp.exp(
        jnp.arange(0, hidden_dim, 2, dtype=jnp.float32)
        * (-math.log(10000.0) / hidden_dim))
    pe = jnp.zeros((max_len, hidden_dim), jnp.float32)
    pe = pe.at[:, 0::2].set(jnp.sin(position * div_term))
    pe = pe.at[:, 1::2].set(jnp.cos(position * div_term))
    return pe


def transformer_forward(src, trg, params, n_heads, pos_embed):
    E = params["enc_embed"].shape[1]
    sqrt_e = math.sqrt(E)

    # encoder (src_mask == attend-to-all; no mask DMA needed)
    x = jnp.take(params["enc_embed"], src, axis=0) * sqrt_e
    x = x + pos_embed[None, : src.shape[1], :]
    for lp in params["enc_layers"]:
        x = encoder_block(x, lp, n_heads)
    enc_out = x

    # decoder (trg_mask == causal, built in-kernel; cross-attn uses src semantics)
    y = jnp.take(params["dec_embed"], trg, axis=0) * sqrt_e
    y = y + pos_embed[None, : trg.shape[1], :]
    for lp in params["dec_layers"]:
        y = decoder_block(y, enc_out, lp, n_heads)

    B, T, _ = y.shape
    logits = linear_bias(y.reshape(B * T, E), params["out_w"], params["out_b"])
    return logits.reshape(B, T, -1)


# ----------------------------------------------------------------------------
# Deterministic parameter initialization (weights bf16 for MXU, LN/bias/embed f32)
# ----------------------------------------------------------------------------
def init_params(key, vocab_size, embed_size, num_layers):
    keys = iter(jax.random.split(key, 512))

    def w(shape, scale=0.02, dtype=jnp.bfloat16):
        return (jax.random.normal(next(keys), shape, jnp.float32) * scale).astype(dtype)

    E = embed_size

    def enc_layer():
        return dict(
            norm1_g=jnp.ones((E,), jnp.float32), norm1_b=jnp.zeros((E,), jnp.float32),
            norm2_g=jnp.ones((E,), jnp.float32), norm2_b=jnp.zeros((E,), jnp.float32),
            qkv_w=w((E, 3 * E)),
            mha_fc_w=w((E, E)),
            ffwd=dict(w1=w((E, 4 * E)), w2=w((4 * E, E))),
        )

    def dec_layer():
        return dict(
            norm1_g=jnp.ones((E,), jnp.float32), norm1_b=jnp.zeros((E,), jnp.float32),
            normraw_g=jnp.ones((E,), jnp.float32), normraw_b=jnp.zeros((E,), jnp.float32),
            normenc_g=jnp.ones((E,), jnp.float32), normenc_b=jnp.zeros((E,), jnp.float32),
            norm3_g=jnp.ones((E,), jnp.float32), norm3_b=jnp.zeros((E,), jnp.float32),
            qkv_w=w((E, 3 * E)),
            mmha_fc_w=w((E, E)),
            mha_fc_w=w((E, E)),
            ffwd=dict(w1=w((E, 4 * E)), w2=w((4 * E, E))),
        )

    return dict(
        enc_embed=w((vocab_size, E), 1.0, jnp.float32),
        dec_embed=w((vocab_size, E), 1.0, jnp.float32),
        enc_layers=[enc_layer() for _ in range(num_layers)],
        dec_layers=[dec_layer() for _ in range(num_layers)],
        out_w=w((E, vocab_size)),
        out_b=jnp.zeros((vocab_size,), jnp.float32),
    )


# ----------------------------------------------------------------------------
if __name__ == "__main__":
    vocab_size = 16
    n_head = 4
    embed_size = 32
    context_length = 8
    num_layers = 2
    B, T = 2, 8

    key = jax.random.PRNGKey(0)
    k_src, k_trg, k_par = jax.random.split(key, 3)
    src = jax.random.randint(k_src, (B, T), 0, vocab_size, dtype=jnp.int32)
    trg = jax.random.randint(k_trg, (B, T), 0, vocab_size, dtype=jnp.int32)

    params = init_params(k_par, vocab_size, embed_size, num_layers)
    pos_embed = sinusoid_encoding(embed_size, context_length)

    @jax.jit
    def fwd(src, trg, params, pos_embed):
        return transformer_forward(src, trg, params, n_head, pos_embed)

    logits = fwd(src, trg, params, pos_embed)
    jax.block_until_ready(logits)
    assert logits.shape == (B, T, vocab_size)
    print("KERNEL_OK")
</pallas_src>

<mosaic_0001>
module attributes {stable_mosaic.version = 11 : i64} {
  func.func @_self_attn_kernel(%arg0: i32, %arg1: memref<1x8x96xf32, #tpu.memory_space<vmem>>, %arg2: memref<4x8x32xbf16, #tpu.memory_space<vmem>>, %arg3: memref<1x8x32xf32, #tpu.memory_space<vmem>>, %arg4: memref<1x8x32xf32, #tpu.memory_space<vmem>>) attributes {dimension_semantics = [#tpu.dimension_semantics<parallel>], iteration_bounds = array<i64: 2>, scalar_prefetch = 0 : i64, scratch_operands = 0 : i64, tpu.core_type = #tpu.core_type<tc>, window_params = [{transform_indices = @transform_0, window_bounds = array<i64: 1, 8, 96>}, {pipeline_mode = #tpu.pipeline_mode<synchronous>, transform_indices = @transform_1, window_bounds = array<i64: 4, 8, 32>}, {transform_indices = @transform_2, window_bounds = array<i64: 1, 8, 32>}, {transform_indices = @transform_3, window_bounds = array<i64: 1, 8, 32>}]} {
    %c0 = arith.constant 0 : index
    %c0_0 = arith.constant 0 : index
    %c0_1 = arith.constant 0 : index
    %0 = vector.load %arg1[%c0, %c0_0, %c0_1] : memref<1x8x96xf32, #tpu.memory_space<vmem>>, vector<1x8x96xf32>
    %1 = vector.shape_cast %0 : vector<1x8x96xf32> to vector<8x96xf32>
    %2 = vector.extract_strided_slice %1 {offsets = [0, 0], sizes = [8, 32], strides = [1, 1]} : vector<8x96xf32> to vector<8x32xf32>
    %3 = vector.extract_strided_slice %1 {offsets = [0, 32], sizes = [8, 32], strides = [1, 1]} : vector<8x96xf32> to vector<8x32xf32>
    %4 = vector.extract_strided_slice %1 {offsets = [0, 64], sizes = [8, 32], strides = [1, 1]} : vector<8x96xf32> to vector<8x32xf32>
    %c0_2 = arith.constant 0 : index
    %c0_3 = arith.constant 0 : index
    %c0_4 = arith.constant 0 : index
    %5 = vector.load %arg3[%c0_2, %c0_3, %c0_4] : memref<1x8x32xf32, #tpu.memory_space<vmem>>, vector<1x8x32xf32>
    %6 = vector.shape_cast %5 : vector<1x8x32xf32> to vector<8x32xf32>
    %7 = tpu.iota {dimensions = array<i32: 0>} : vector<8x8xi32>
    %8 = tpu.iota {dimensions = array<i32: 1>} : vector<8x8xi32>
    %9 = arith.cmpi sge, %7, %8 : vector<8x8xi32>
    %cst = arith.constant 0.000000e+00 : f32
    %cst_5 = arith.constant -1.000000e+30 : f32
    %10 = vector.broadcast %cst : f32 to vector<8x8xf32>
    %11 = vector.broadcast %cst_5 : f32 to vector<8x8xf32>
    %12 = arith.select %9, %10, %11 : vector<8x8xi1>, vector<8x8xf32>
    %13 = vector.extract_strided_slice %2 {offsets = [0, 0], sizes = [8, 8], strides = [1, 1]} : vector<8x32xf32> to vector<8x8xf32>
    %14 = arith.truncf %13 : vector<8x8xf32> to vector<8x8xbf16>
    %15 = vector.extract_strided_slice %3 {offsets = [0, 0], sizes = [8, 8], strides = [1, 1]} : vector<8x32xf32> to vector<8x8xf32>
    %16 = arith.truncf %15 : vector<8x8xf32> to vector<8x8xbf16>
    %cst_6 = arith.constant dense<0.000000e+00> : vector<8x8xf32>
    %17 = tpu.matmul %14, %16, %cst_6 {dimension_numbers = #tpu.dot_dimension_numbers<[1], [1], [0], [0], [0, 0, 1, 0], [], []>} : vector<8x8xbf16>, vector<8x8xbf16>, vector<8x8xf32> -> vector<8x8xf32>
    %cst_7 = arith.constant 0.353553385 : f32
    %18 = vector.broadcast %cst_7 : f32 to vector<8x8xf32>
    %19 = arith.mulf %17, %18 : vector<8x8xf32>
    %20 = arith.addf %19, %12 : vector<8x8xf32>
    %cst_8 = arith.constant dense<0xFF800000> : vector<8xf32>
    %21 = vector.multi_reduction <maximumf>, %20, %cst_8 [1] : vector<8x8xf32> to vector<8xf32>
    %22 = vector.shape_cast %21 : vector<8xf32> to vector<8x1xf32>
    %23 = vector.broadcast %22 : vector<8x1xf32> to vector<8x8xf32>
    %24 = arith.subf %20, %23 : vector<8x8xf32>
    %25 = math.exp %24 : vector<8x8xf32>
    %cst_9 = arith.constant dense<0.000000e+00> : vector<8xf32>
    %26 = vector.multi_reduction <add>, %25, %cst_9 [1] : vector<8x8xf32> to vector<8xf32>
    %27 = vector.shape_cast %26 : vector<8xf32> to vector<8x1xf32>
    %28 = tpu.reciprocal %27 {approx = true} : vector<8x1xf32> -> vector<8x1xf32>
    %29 = vector.broadcast %28 : vector<8x1xf32> to vector<8x8xf32>
    %30 = arith.mulf %25, %29 : vector<8x8xf32>
    %31 = arith.truncf %30 : vector<8x8xf32> to vector<8x8xbf16>
    %32 = vector.extract_strided_slice %4 {offsets = [0, 0], sizes = [8, 8], strides = [1, 1]} : vector<8x32xf32> to vector<8x8xf32>
    %33 = arith.truncf %32 : vector<8x8xf32> to vector<8x8xbf16>
    %cst_10 = arith.constant dense<0.000000e+00> : vector<8x8xf32>
    %34 = tpu.matmul %31, %33, %cst_10 {dimension_numbers = #tpu.dot_dimension_numbers<[1], [0], [0], [1], [0, 0, 1, 1], [], []>} : vector<8x8xbf16>, vector<8x8xbf16>, vector<8x8xf32> -> vector<8x8xf32>
    %35 = arith.truncf %34 : vector<8x8xf32> to vector<8x8xbf16>
    %c0_11 = arith.constant 0 : index
    %c0_12 = arith.constant 0 : index
    %c0_13 = arith.constant 0 : index
    %36 = vector.load %arg2[%c0_11, %c0_12, %c0_13] : memref<4x8x32xbf16, #tpu.memory_space<vmem>>, vector<1x8x32xbf16>
    %37 = vector.shape_cast %36 : vector<1x8x32xbf16> to vector<8x32xbf16>
    %cst_14 = arith.constant dense<0.000000e+00> : vector<8x32xf32>
    %38 = tpu.matmul %35, %37, %cst_14 {dimension_numbers = #tpu.dot_dimension_numbers<[1], [0], [0], [1], [0, 0, 1, 1], [], []>} : vector<8x8xbf16>, vector<8x32xbf16>, vector<8x32xf32> -> vector<8x32xf32>
    %39 = arith.addf %6, %38 : vector<8x32xf32>
    %40 = vector.extract_strided_slice %2 {offsets = [0, 8], sizes = [8, 8], strides = [1, 1]} : vector<8x32xf32> to vector<8x8xf32>
    %41 = arith.truncf %40 : vector<8x8xf32> to vector<8x8xbf16>
    %42 = vector.extract_strided_slice %3 {offsets = [0, 8], sizes = [8, 8], strides = [1, 1]} : vector<8x32xf32> to vector<8x8xf32>
    %43 = arith.truncf %42 : vector<8x8xf32> to vector<8x8xbf16>
    %cst_15 = arith.constant dense<0.000000e+00> : vector<8x8xf32>
    %44 = tpu.matmul %41, %43, %cst_15 {dimension_numbers = #tpu.dot_dimension_numbers<[1], [1], [0], [0], [0, 0, 1, 0], [], []>} : vector<8x8xbf16>, vector<8x8xbf16>, vector<8x8xf32> -> vector<8x8xf32>
    %cst_16 = arith.constant 0.353553385 : f32
    %45 = vector.broadcast %cst_16 : f32 to vector<8x8xf32>
    %46 = arith.mulf %44, %45 : vector<8x8xf32>
    %47 = arith.addf %46, %12 : vector<8x8xf32>
    %cst_17 = arith.constant dense<0xFF800000> : vector<8xf32>
    %48 = vector.multi_reduction <maximumf>, %47, %cst_17 [1] : vector<8x8xf32> to vector<8xf32>
    %49 = vector.shape_cast %48 : vector<8xf32> to vector<8x1xf32>
    %50 = vector.broadcast %49 : vector<8x1xf32> to vector<8x8xf32>
    %51 = arith.subf %47, %50 : vector<8x8xf32>
    %52 = math.exp %51 : vector<8x8xf32>
    %cst_18 = arith.constant dense<0.000000e+00> : vector<8xf32>
    %53 = vector.multi_reduction <add>, %52, %cst_18 [1] : vector<8x8xf32> to vector<8xf32>
    %54 = vector.shape_cast %53 : vector<8xf32> to vector<8x1xf32>
    %55 = tpu.reciprocal %54 {approx = true} : vector<8x1xf32> -> vector<8x1xf32>
    %56 = vector.broadcast %55 : vector<8x1xf32> to vector<8x8xf32>
    %57 = arith.mulf %52, %56 : vector<8x8xf32>
    %58 = arith.truncf %57 : vector<8x8xf32> to vector<8x8xbf16>
    %59 = vector.extract_strided_slice %4 {offsets = [0, 8], sizes = [8, 8], strides = [1, 1]} : vector<8x32xf32> to vector<8x8xf32>
    %60 = arith.truncf %59 : vector<8x8xf32> to vector<8x8xbf16>
    %cst_19 = arith.constant dense<0.000000e+00> : vector<8x8xf32>
    %61 = tpu.matmul %58, %60, %cst_19 {dimension_numbers = #tpu.dot_dimension_numbers<[1], [0], [0], [1], [0, 0, 1, 1], [], []>} : vector<8x8xbf16>, vector<8x8xbf16>, vector<8x8xf32> -> vector<8x8xf32>
    %62 = arith.truncf %61 : vector<8x8xf32> to vector<8x8xbf16>
    %c1 = arith.constant 1 : index
    %c0_20 = arith.constant 0 : index
    %c0_21 = arith.constant 0 : index
    %63 = vector.load %arg2[%c1, %c0_20, %c0_21] : memref<4x8x32xbf16, #tpu.memory_space<vmem>>, vector<1x8x32xbf16>
    %64 = vector.shape_cast %63 : vector<1x8x32xbf16> to vector<8x32xbf16>
    %cst_22 = arith.constant dense<0.000000e+00> : vector<8x32xf32>
    %65 = tpu.matmul %62, %64, %cst_22 {dimension_numbers = #tpu.dot_dimension_numbers<[1], [0], [0], [1], [0, 0, 1, 1], [], []>} : vector<8x8xbf16>, vector<8x32xbf16>, vector<8x32xf32> -> vector<8x32xf32>
    %66 = arith.addf %39, %65 : vector<8x32xf32>
    %67 = vector.extract_strided_slice %2 {offsets = [0, 16], sizes = [8, 8], strides = [1, 1]} : vector<8x32xf32> to vector<8x8xf32>
    %68 = arith.truncf %67 : vector<8x8xf32> to vector<8x8xbf16>
    %69 = vector.extract_strided_slice %3 {offsets = [0, 16], sizes = [8, 8], strides = [1, 1]} : vector<8x32xf32> to vector<8x8xf32>
    %70 = arith.truncf %69 : vector<8x8xf32> to vector<8x8xbf16>
    %cst_23 = arith.constant dense<0.000000e+00> : vector<8x8xf32>
    %71 = tpu.matmul %68, %70, %cst_23 {dimension_numbers = #tpu.dot_dimension_numbers<[1], [1], [0], [0], [0, 0, 1, 0], [], []>} : vector<8x8xbf16>, vector<8x8xbf16>, vector<8x8xf32> -> vector<8x8xf32>
    %cst_24 = arith.constant 0.353553385 : f32
    %72 = vector.broadcast %cst_24 : f32 to vector<8x8xf32>
    %73 = arith.mulf %71, %72 : vector<8x8xf32>
    %74 = arith.addf %73, %12 : vector<8x8xf32>
    %cst_25 = arith.constant dense<0xFF800000> : vector<8xf32>
    %75 = vector.multi_reduction <maximumf>, %74, %cst_25 [1] : vector<8x8xf32> to vector<8xf32>
    %76 = vector.shape_cast %75 : vector<8xf32> to vector<8x1xf32>
    %77 = vector.broadcast %76 : vector<8x1xf32> to vector<8x8xf32>
    %78 = arith.subf %74, %77 : vector<8x8xf32>
    %79 = math.exp %78 : vector<8x8xf32>
    %cst_26 = arith.constant dense<0.000000e+00> : vector<8xf32>
    %80 = vector.multi_reduction <add>, %79, %cst_26 [1] : vector<8x8xf32> to vector<8xf32>
    %81 = vector.shape_cast %80 : vector<8xf32> to vector<8x1xf32>
    %82 = tpu.reciprocal %81 {approx = true} : vector<8x1xf32> -> vector<8x1xf32>
    %83 = vector.broadcast %82 : vector<8x1xf32> to vector<8x8xf32>
    %84 = arith.mulf %79, %83 : vector<8x8xf32>
    %85 = arith.truncf %84 : vector<8x8xf32> to vector<8x8xbf16>
    %86 = vector.extract_strided_slice %4 {offsets = [0, 16], sizes = [8, 8], strides = [1, 1]} : vector<8x32xf32> to vector<8x8xf32>
    %87 = arith.truncf %86 : vector<8x8xf32> to vector<8x8xbf16>
    %cst_27 = arith.constant dense<0.000000e+00> : vector<8x8xf32>
    %88 = tpu.matmul %85, %87, %cst_27 {dimension_numbers = #tpu.dot_dimension_numbers<[1], [0], [0], [1], [0, 0, 1, 1], [], []>} : vector<8x8xbf16>, vector<8x8xbf16>, vector<8x8xf32> -> vector<8x8xf32>
    %89 = arith.truncf %88 : vector<8x8xf32> to vector<8x8xbf16>
    %c2 = arith.constant 2 : index
    %c0_28 = arith.constant 0 : index
    %c0_29 = arith.constant 0 : index
    %90 = vector.load %arg2[%c2, %c0_28, %c0_29] : memref<4x8x32xbf16, #tpu.memory_space<vmem>>, vector<1x8x32xbf16>
    %91 = vector.shape_cast %90 : vector<1x8x32xbf16> to vector<8x32xbf16>
    %cst_30 = arith.constant dense<0.000000e+00> : vector<8x32xf32>
    %92 = tpu.matmul %89, %91, %cst_30 {dimension_numbers = #tpu.dot_dimension_numbers<[1], [0], [0], [1], [0, 0, 1, 1], [], []>} : vector<8x8xbf16>, vector<8x32xbf16>, vector<8x32xf32> -> vector<8x32xf32>
    %93 = arith.addf %66, %92 : vector<8x32xf32>
    %94 = vector.extract_strided_slice %2 {offsets = [0, 24], sizes = [8, 8], strides = [1, 1]} : vector<8x32xf32> to vector<8x8xf32>
    %95 = arith.truncf %94 : vector<8x8xf32> to vector<8x8xbf16>
    %96 = vector.extract_strided_slice %3 {offsets = [0, 24], sizes = [8, 8], strides = [1, 1]} : vector<8x32xf32> to vector<8x8xf32>
    %97 = arith.truncf %96 : vector<8x8xf32> to vector<8x8xbf16>
    %cst_31 = arith.constant dense<0.000000e+00> : vector<8x8xf32>
    %98 = tpu.matmul %95, %97, %cst_31 {dimension_numbers = #tpu.dot_dimension_numbers<[1], [1], [0], [0], [0, 0, 1, 0], [], []>} : vector<8x8xbf16>, vector<8x8xbf16>, vector<8x8xf32> -> vector<8x8xf32>
    %cst_32 = arith.constant 0.353553385 : f32
    %99 = vector.broadcast %cst_32 : f32 to vector<8x8xf32>
    %100 = arith.mulf %98, %99 : vector<8x8xf32>
    %101 = arith.addf %100, %12 : vector<8x8xf32>
    %cst_33 = arith.constant dense<0xFF800000> : vector<8xf32>
    %102 = vector.multi_reduction <maximumf>, %101, %cst_33 [1] : vector<8x8xf32> to vector<8xf32>
    %103 = vector.shape_cast %102 : vector<8xf32> to vector<8x1xf32>
    %104 = vector.broadcast %103 : vector<8x1xf32> to vector<8x8xf32>
    %105 = arith.subf %101, %104 : vector<8x8xf32>
    %106 = math.exp %105 : vector<8x8xf32>
    %cst_34 = arith.constant dense<0.000000e+00> : vector<8xf32>
    %107 = vector.multi_reduction <add>, %106, %cst_34 [1] : vector<8x8xf32> to vector<8xf32>
    %108 = vector.shape_cast %107 : vector<8xf32> to vector<8x1xf32>
    %109 = tpu.reciprocal %108 {approx = true} : vector<8x1xf32> -> vector<8x1xf32>
    %110 = vector.broadcast %109 : vector<8x1xf32> to vector<8x8xf32>
    %111 = arith.mulf %106, %110 : vector<8x8xf32>
    %112 = arith.truncf %111 : vector<8x8xf32> to vector<8x8xbf16>
    %113 = vector.extract_strided_slice %4 {offsets = [0, 24], sizes = [8, 8], strides = [1, 1]} : vector<8x32xf32> to vector<8x8xf32>
    %114 = arith.truncf %113 : vector<8x8xf32> to vector<8x8xbf16>
    %cst_35 = arith.constant dense<0.000000e+00> : vector<8x8xf32>
    %115 = tpu.matmul %112, %114, %cst_35 {dimension_numbers = #tpu.dot_dimension_numbers<[1], [0], [0], [1], [0, 0, 1, 1], [], []>} : vector<8x8xbf16>, vector<8x8xbf16>, vector<8x8xf32> -> vector<8x8xf32>
    %116 = arith.truncf %115 : vector<8x8xf32> to vector<8x8xbf16>
    %c3 = arith.constant 3 : index
    %c0_36 = arith.constant 0 : index
    %c0_37 = arith.constant 0 : index
    %117 = vector.load %arg2[%c3, %c0_36, %c0_37] : memref<4x8x32xbf16, #tpu.memory_space<vmem>>, vector<1x8x32xbf16>
    %118 = vector.shape_cast %117 : vector<1x8x32xbf16> to vector<8x32xbf16>
    %cst_38 = arith.constant dense<0.000000e+00> : vector<8x32xf32>
    %119 = tpu.matmul %116, %118, %cst_38 {dimension_numbers = #tpu.dot_dimension_numbers<[1], [0], [0], [1], [0, 0, 1, 1], [], []>} : vector<8x8xbf16>, vector<8x32xbf16>, vector<8x32xf32> -> vector<8x32xf32>
    %120 = arith.addf %93, %119 : vector<8x32xf32>
    %c0_39 = arith.constant 0 : index
    %c0_40 = arith.constant 0 : index
    %c0_41 = arith.constant 0 : index
    %121 = vector.load %arg4[%c0_39, %c0_40, %c0_41] : memref<1x8x32xf32, #tpu.memory_space<vmem>>, vector<1x8x32xf32>
    %122 = vector.shape_cast %121 : vector<1x8x32xf32> to vector<8x32xf32>
    %123 = vector.shape_cast %120 : vector<8x32xf32> to vector<1x8x32xf32>
    tpu.vector_store %arg4[%c0_39, %c0_40, %c0_41], %123 {strides = array<i32>} : memref<1x8x32xf32, #tpu.memory_space<vmem>>, vector<1x8x32xf32>,
    return
  }
  func.func @transform_0(%arg0: i32) -> (i32, i32, i32) {
    %c0_i32 = arith.constant 0 : i32
    %c0_i32_0 = arith.constant 0 : i32
    %c0_i32_1 = arith.constant 0 : i32
    return %arg0, %c0_i32, %c0_i32_0 : i32, i32, i32
  }
  func.func @transform_1(%arg0: i32) -> (i32, i32, i32) {
    %c0_i32 = arith.constant 0 : i32
    %c0_i32_0 = arith.constant 0 : i32
    %c0_i32_1 = arith.constant 0 : i32
    %c0_i32_2 = arith.constant 0 : i32
    return %c0_i32, %c0_i32_0, %c0_i32_1 : i32, i32, i32
  }
  func.func @transform_2(%arg0: i32) -> (i32, i32, i32) {
    %c0_i32 = arith.constant 0 : i32
    %c0_i32_0 = arith.constant 0 : i32
    %c0_i32_1 = arith.constant 0 : i32
    return %arg0, %c0_i32, %c0_i32_0 : i32, i32, i32
  }
  func.func @transform_3(%arg0: i32) -> (i32, i32, i32) {
    %c0_i32 = arith.constant 0 : i32
    %c0_i32_0 = arith.constant 0 : i32
    %c0_i32_1 = arith.constant 0 : i32
    return %arg0, %c0_i32, %c0_i32_0 : i32, i32, i32
  }
}

module attributes {stable_mosaic.version = 11 : i64} {
  func.func @_ln_matmul_kernel(%arg0: i32, %arg1: memref<16x32xf32, #tpu.memory_space<vmem>>, %arg2: memref<1x32xf32, #tpu.memory_space<vmem>>, %arg3: memref<1x32xf32, #tpu.memory_space<vmem>>, %arg4: memref<32x96xbf16, #tpu.memory_space<vmem>>, %arg5: memref<16x32xf32, #tpu.memory_space<vmem>>, %arg6: memref<16x96xf32, #tpu.memory_space<vmem>>) attributes {dimension_semantics = [#tpu.dimension_semantics<parallel>], iteration_bounds = array<i64: 1>, scalar_prefetch = 0 : i64, scratch_operands = 0 : i64, tpu.core_type = #tpu.core_type<tc>, window_params = [{transform_indices = @transform_0, window_bounds = array<i64: 16, 32>}, {pipeline_mode = #tpu.pipeline_mode<synchronous>, transform_indices = @transform_1, window_bounds = array<i64: 1, 32>}, {pipeline_mode = #tpu.pipeline_mode<synchronous>, transform_indices = @transform_2, window_bounds = array<i64: 1, 32>}, {pipeline_mode = #tpu.pipeline_mode<synchronous>, transform_indices = @transform_3, window_bounds = array<i64: 32, 96>}, {transform_indices = @transform_4, window_bounds = array<i64: 16, 32>}, {transform_indices = @transform_5, window_bounds = array<i64: 16, 96>}]} {
    %c0 = arith.constant 0 : index
    %c0_0 = arith.constant 0 : index
    %0 = vector.load %arg1[%c0, %c0_0] : memref<16x32xf32, #tpu.memory_space<vmem>>, vector<16x32xf32>
    %c0_1 = arith.constant 0 : index
    %c0_2 = arith.constant 0 : index
    %1 = vector.load %arg2[%c0_1, %c0_2] : memref<1x32xf32, #tpu.memory_space<vmem>>, vector<1x32xf32>
    %c0_3 = arith.constant 0 : index
    %c0_4 = arith.constant 0 : index
    %2 = vector.load %arg3[%c0_3, %c0_4] : memref<1x32xf32, #tpu.memory_space<vmem>>, vector<1x32xf32>
    %cst = arith.constant dense<0.000000e+00> : vector<16xf32>
    %3 = vector.multi_reduction <add>, %0, %cst [1] : vector<16x32xf32> to vector<16xf32>
    %4 = vector.shape_cast %3 : vector<16xf32> to vector<16x1xf32>
    %cst_5 = arith.constant 3.200000e+01 : f32
    %5 = vector.broadcast %cst_5 : f32 to vector<16x1xf32>
    %6 = arith.divf %4, %5 : vector<16x1xf32>
    %7 = vector.broadcast %6 : vector<16x1xf32> to vector<16x32xf32>
    %8 = arith.subf %0, %7 : vector<16x32xf32>
    %9 = arith.mulf %8, %8 : vector<16x32xf32>
    %cst_6 = arith.constant dense<0.000000e+00> : vector<16xf32>
    %10 = vector.multi_reduction <add>, %9, %cst_6 [1] : vector<16x32xf32> to vector<16xf32>
    %11 = vector.shape_cast %10 : vector<16xf32> to vector<16x1xf32>
    %cst_7 = arith.constant 3.200000e+01 : f32
    %12 = vector.broadcast %cst_7 : f32 to vector<16x1xf32>
    %13 = arith.divf %11, %12 : vector<16x1xf32>
    %14 = vector.broadcast %6 : vector<16x1xf32> to vector<16x32xf32>
    %15 = arith.subf %0, %14 : vector<16x32xf32>
    %cst_8 = arith.constant 9.99999974E-6 : f32
    %16 = vector.broadcast %cst_8 : f32 to vector<16x1xf32>
    %17 = arith.addf %13, %16 : vector<16x1xf32>
    %18 = math.rsqrt %17 : vector<16x1xf32>
    %19 = vector.broadcast %18 : vector<16x1xf32> to vector<16x32xf32>
    %20 = arith.mulf %15, %19 : vector<16x32xf32>
    %21 = vector.broadcast %1 : vector<1x32xf32> to vector<16x32xf32>
    %22 = arith.mulf %20, %21 : vector<16x32xf32>
    %23 = vector.broadcast %2 : vector<1x32xf32> to vector<16x32xf32>
    %24 = arith.addf %22, %23 : vector<16x32xf32>
    %c0_9 = arith.constant 0 : index
    %c0_10 = arith.constant 0 : index
    %25 = vector.load %arg5[%c0_9, %c0_10] : memref<16x32xf32, #tpu.memory_space<vmem>>, vector<16x32xf32>
    tpu.vector_store %arg5[%c0_9, %c0_10], %24 {strides = array<i32>} : memref<16x32xf32, #tpu.memory_space<vmem>>, vector<16x32xf32>,
    %26 = arith.truncf %24 : vector<16x32xf32> to vector<16x32xbf16>
    %c0_11 = arith.constant 0 : index
    %c0_12 = arith.constant 0 : index
    %27 = vector.load %arg4[%c0_11, %c0_12] : memref<32x96xbf16, #tpu.memory_space<vmem>>, vector<32x96xbf16>
    %cst_13 = arith.constant dense<0.000000e+00> : vector<16x96xf32>
    %28 = tpu.matmul %26, %27, %cst_13 {dimension_numbers = #tpu.dot_dimension_numbers<[1], [0], [0], [1], [0, 0, 1, 1], [], []>} : vector<16x32xbf16>, vector<32x96xbf16>, vector<16x96xf32> -> vector<16x96xf32>
    %c0_14 = arith.constant 0 : index
    %c0_15 = arith.constant 0 : index
    %29 = vector.load %arg6[%c0_14, %c0_15] : memref<16x96xf32, #tpu.memory_space<vmem>>, vector<16x96xf32>
    tpu.vector_store %arg6[%c0_14, %c0_15], %28 {strides = array<i32>} : memref<16x96xf32, #tpu.memory_space<vmem>>, vector<16x96xf32>,
    return
  }
  func.func @transform_0(%arg0: i32) -> (i32, i32) {
    %c0_i32 = arith.constant 0 : i32
    %c0_i32_0 = arith.constant 0 : i32
    return %arg0, %c0_i32 : i32, i32
  }
  func.func @transform_1(%arg0: i32) -> (i32, i32) {
    %c0_i32 = arith.constant 0 : i32
    %c0_i32_0 = arith.constant 0 : i32
    %c0_i32_1 = arith.constant 0 : i32
    return %c0_i32, %c0_i32_0 : i32, i32
  }
  func.func @transform_2(%arg0: i32) -> (i32, i32) {
    %c0_i32 = arith.constant 0 : i32
    %c0_i32_0 = arith.constant 0 : i32
    %c0_i32_1 = arith.constant 0 : i32
    return %c0_i32, %c0_i32_0 : i32, i32
  }
  func.func @transform_3(%arg0: i32) -> (i32, i32) {
    %c0_i32 = arith.constant 0 : i32
    %c0_i32_0 = arith.constant 0 : i32
    %c0_i32_1 = arith.constant 0 : i32
    return %c0_i32, %c0_i32_0 : i32, i32
  }
  func.func @transform_4(%arg0: i32) -> (i32, i32) {
    %c0_i32 = arith.constant 0 : i32
    %c0_i32_0 = arith.constant 0 : i32
    return %arg0, %c0_i32 : i32, i32
  }
  func.func @transform_5(%arg0: i32) -> (i32, i32) {
    %c0_i32 = arith.constant 0 : i32
    %c0_i32_0 = arith.constant 0 : i32
    return %arg0, %c0_i32 : i32, i32
  }
}

module attributes {stable_mosaic.version = 11 : i64} {
  func.func @_self_attn_kernel(%arg0: i32, %arg1: memref<1x8x96xf32, #tpu.memory_space<vmem>>, %arg2: memref<4x8x32xbf16, #tpu.memory_space<vmem>>, %arg3: memref<1x8x32xf32, #tpu.memory_space<vmem>>, %arg4: memref<1x8x32xf32, #tpu.memory_space<vmem>>) attributes {dimension_semantics = [#tpu.dimension_semantics<parallel>], iteration_bounds = array<i64: 2>, scalar_prefetch = 0 : i64, scratch_operands = 0 : i64, tpu.core_type = #tpu.core_type<tc>, window_params = [{transform_indices = @transform_0, window_bounds = array<i64: 1, 8, 96>}, {pipeline_mode = #tpu.pipeline_mode<synchronous>, transform_indices = @transform_1, window_bounds = array<i64: 4, 8, 32>}, {transform_indices = @transform_2, window_bounds = array<i64: 1, 8, 32>}, {transform_indices = @transform_3, window_bounds = array<i64: 1, 8, 32>}]} {
    %c0 = arith.constant 0 : index
    %c0_0 = arith.constant 0 : index
    %c0_1 = arith.constant 0 : index
    %0 = vector.load %arg1[%c0, %c0_0, %c0_1] : memref<1x8x96xf32, #tpu.memory_space<vmem>>, vector<1x8x96xf32>
    %1 = vector.shape_cast %0 : vector<1x8x96xf32> to vector<8x96xf32>
    %2 = vector.extract_strided_slice %1 {offsets = [0, 0], sizes = [8, 32], strides = [1, 1]} : vector<8x96xf32> to vector<8x32xf32>
    %3 = vector.extract_strided_slice %1 {offsets = [0, 32], sizes = [8, 32], strides = [1, 1]} : vector<8x96xf32> to vector<8x32xf32>
    %4 = vector.extract_strided_slice %1 {offsets = [0, 64], sizes = [8, 32], strides = [1, 1]} : vector<8x96xf32> to vector<8x32xf32>
    %c0_2 = arith.constant 0 : index
    %c0_3 = arith.constant 0 : index
    %c0_4 = arith.constant 0 : index
    %5 = vector.load %arg3[%c0_2, %c0_3, %c0_4] : memref<1x8x32xf32, #tpu.memory_space<vmem>>, vector<1x8x32xf32>
    %6 = vector.shape_cast %5 : vector<1x8x32xf32> to vector<8x32xf32>
    %7 = vector.extract_strided_slice %2 {offsets = [0, 0], sizes = [8, 8], strides = [1, 1]} : vector<8x32xf32> to vector<8x8xf32>
    %8 = arith.truncf %7 : vector<8x8xf32> to vector<8x8xbf16>
    %9 = vector.extract_strided_slice %3 {offsets = [0, 0], sizes = [8, 8], strides = [1, 1]} : vector<8x32xf32> to vector<8x8xf32>
    %10 = arith.truncf %9 : vector<8x8xf32> to vector<8x8xbf16>
    %cst = arith.constant dense<0.000000e+00> : vector<8x8xf32>
    %11 = tpu.matmul %8, %10, %cst {dimension_numbers = #tpu.dot_dimension_numbers<[1], [1], [0], [0], [0, 0, 1, 0], [], []>} : vector<8x8xbf16>, vector<8x8xbf16>, vector<8x8xf32> -> vector<8x8xf32>
    %cst_5 = arith.constant 0.353553385 : f32
    %12 = vector.broadcast %cst_5 : f32 to vector<8x8xf32>
    %13 = arith.mulf %11, %12 : vector<8x8xf32>
    %cst_6 = arith.constant dense<0xFF800000> : vector<8xf32>
    %14 = vector.multi_reduction <maximumf>, %13, %cst_6 [1] : vector<8x8xf32> to vector<8xf32>
    %15 = vector.shape_cast %14 : vector<8xf32> to vector<8x1xf32>
    %16 = vector.broadcast %15 : vector<8x1xf32> to vector<8x8xf32>
    %17 = arith.subf %13, %16 : vector<8x8xf32>
    %18 = math.exp %17 : vector<8x8xf32>
    %cst_7 = arith.constant dense<0.000000e+00> : vector<8xf32>
    %19 = vector.multi_reduction <add>, %18, %cst_7 [1] : vector<8x8xf32> to vector<8xf32>
    %20 = vector.shape_cast %19 : vector<8xf32> to vector<8x1xf32>
    %21 = tpu.reciprocal %20 {approx = true} : vector<8x1xf32> -> vector<8x1xf32>
    %22 = vector.broadcast %21 : vector<8x1xf32> to vector<8x8xf32>
    %23 = arith.mulf %18, %22 : vector<8x8xf32>
    %24 = arith.truncf %23 : vector<8x8xf32> to vector<8x8xbf16>
    %25 = vector.extract_strided_slice %4 {offsets = [0, 0], sizes = [8, 8], strides = [1, 1]} : vector<8x32xf32> to vector<8x8xf32>
    %26 = arith.truncf %25 : vector<8x8xf32> to vector<8x8xbf16>
    %cst_8 = arith.constant dense<0.000000e+00> : vector<8x8xf32>
    %27 = tpu.matmul %24, %26, %cst_8 {dimension_numbers = #tpu.dot_dimension_numbers<[1], [0], [0], [1], [0, 0, 1, 1], [], []>} : vector<8x8xbf16>, vector<8x8xbf16>, vector<8x8xf32> -> vector<8x8xf32>
    %28 = arith.truncf %27 : vector<8x8xf32> to vector<8x8xbf16>
    %c0_9 = arith.constant 0 : index
    %c0_10 = arith.constant 0 : index
    %c0_11 = arith.constant 0 : index
    %29 = vector.load %arg2[%c0_9, %c0_10, %c0_11] : memref<4x8x32xbf16, #tpu.memory_space<vmem>>, vector<1x8x32xbf16>
    %30 = vector.shape_cast %29 : vector<1x8x32xbf16> to vector<8x32xbf16>
    %cst_12 = arith.constant dense<0.000000e+00> : vector<8x32xf32>
    %31 = tpu.matmul %28, %30, %cst_12 {dimension_numbers = #tpu.dot_dimension_numbers<[1], [0], [0], [1], [0, 0, 1, 1], [], []>} : vector<8x8xbf16>, vector<8x32xbf16>, vector<8x32xf32> -> vector<8x32xf32>
    %32 = arith.addf %6, %31 : vector<8x32xf32>
    %33 = vector.extract_strided_slice %2 {offsets = [0, 8], sizes = [8, 8], strides = [1, 1]} : vector<8x32xf32> to vector<8x8xf32>
    %34 = arith.truncf %33 : vector<8x8xf32> to vector<8x8xbf16>
    %35 = vector.extract_strided_slice %3 {offsets = [0, 8], sizes = [8, 8], strides = [1, 1]} : vector<8x32xf32> to vector<8x8xf32>
    %36 = arith.truncf %35 : vector<8x8xf32> to vector<8x8xbf16>
    %cst_13 = arith.constant dense<0.000000e+00> : vector<8x8xf32>
    %37 = tpu.matmul %34, %36, %cst_13 {dimension_numbers = #tpu.dot_dimension_numbers<[1], [1], [0], [0], [0, 0, 1, 0], [], []>} : vector<8x8xbf16>, vector<8x8xbf16>, vector<8x8xf32> -> vector<8x8xf32>
    %cst_14 = arith.constant 0.353553385 : f32
    %38 = vector.broadcast %cst_14 : f32 to vector<8x8xf32>
    %39 = arith.mulf %37, %38 : vector<8x8xf32>
    %cst_15 = arith.constant dense<0xFF800000> : vector<8xf32>
    %40 = vector.multi_reduction <maximumf>, %39, %cst_15 [1] : vector<8x8xf32> to vector<8xf32>
    %41 = vector.shape_cast %40 : vector<8xf32> to vector<8x1xf32>
    %42 = vector.broadcast %41 : vector<8x1xf32> to vector<8x8xf32>
    %43 = arith.subf %39, %42 : vector<8x8xf32>
    %44 = math.exp %43 : vector<8x8xf32>
    %cst_16 = arith.constant dense<0.000000e+00> : vector<8xf32>
    %45 = vector.multi_reduction <add>, %44, %cst_16 [1] : vector<8x8xf32> to vector<8xf32>
    %46 = vector.shape_cast %45 : vector<8xf32> to vector<8x1xf32>
    %47 = tpu.reciprocal %46 {approx = true} : vector<8x1xf32> -> vector<8x1xf32>
    %48 = vector.broadcast %47 : vector<8x1xf32> to vector<8x8xf32>
    %49 = arith.mulf %44, %48 : vector<8x8xf32>
    %50 = arith.truncf %49 : vector<8x8xf32> to vector<8x8xbf16>
    %51 = vector.extract_strided_slice %4 {offsets = [0, 8], sizes = [8, 8], strides = [1, 1]} : vector<8x32xf32> to vector<8x8xf32>
    %52 = arith.truncf %51 : vector<8x8xf32> to vector<8x8xbf16>
    %cst_17 = arith.constant dense<0.000000e+00> : vector<8x8xf32>
    %53 = tpu.matmul %50, %52, %cst_17 {dimension_numbers = #tpu.dot_dimension_numbers<[1], [0], [0], [1], [0, 0, 1, 1], [], []>} : vector<8x8xbf16>, vector<8x8xbf16>, vector<8x8xf32> -> vector<8x8xf32>
    %54 = arith.truncf %53 : vector<8x8xf32> to vector<8x8xbf16>
    %c1 = arith.constant 1 : index
    %c0_18 = arith.constant 0 : index
    %c0_19 = arith.constant 0 : index
    %55 = vector.load %arg2[%c1, %c0_18, %c0_19] : memref<4x8x32xbf16, #tpu.memory_space<vmem>>, vector<1x8x32xbf16>
    %56 = vector.shape_cast %55 : vector<1x8x32xbf16> to vector<8x32xbf16>
    %cst_20 = arith.constant dense<0.000000e+00> : vector<8x32xf32>
    %57 = tpu.matmul %54, %56, %cst_20 {dimension_numbers = #tpu.dot_dimension_numbers<[1], [0], [0], [1], [0, 0, 1, 1], [], []>} : vector<8x8xbf16>, vector<8x32xbf16>, vector<8x32xf32> -> vector<8x32xf32>
    %58 = arith.addf %32, %57 : vector<8x32xf32>
    %59 = vector.extract_strided_slice %2 {offsets = [0, 16], sizes = [8, 8], strides = [1, 1]} : vector<8x32xf32> to vector<8x8xf32>
    %60 = arith.truncf %59 : vector<8x8xf32> to vector<8x8xbf16>
    %61 = vector.extract_strided_slice %3 {offsets = [0, 16], sizes = [8, 8], strides = [1, 1]} : vector<8x32xf32> to vector<8x8xf32>
    %62 = arith.truncf %61 : vector<8x8xf32> to vector<8x8xbf16>
    %cst_21 = arith.constant dense<0.000000e+00> : vector<8x8xf32>
    %63 = tpu.matmul %60, %62, %cst_21 {dimension_numbers = #tpu.dot_dimension_numbers<[1], [1], [0], [0], [0, 0, 1, 0], [], []>} : vector<8x8xbf16>, vector<8x8xbf16>, vector<8x8xf32> -> vector<8x8xf32>
    %cst_22 = arith.constant 0.353553385 : f32
    %64 = vector.broadcast %cst_22 : f32 to vector<8x8xf32>
    %65 = arith.mulf %63, %64 : vector<8x8xf32>
    %cst_23 = arith.constant dense<0xFF800000> : vector<8xf32>
    %66 = vector.multi_reduction <maximumf>, %65, %cst_23 [1] : vector<8x8xf32> to vector<8xf32>
    %67 = vector.shape_cast %66 : vector<8xf32> to vector<8x1xf32>
    %68 = vector.broadcast %67 : vector<8x1xf32> to vector<8x8xf32>
    %69 = arith.subf %65, %68 : vector<8x8xf32>
    %70 = math.exp %69 : vector<8x8xf32>
    %cst_24 = arith.constant dense<0.000000e+00> : vector<8xf32>
    %71 = vector.multi_reduction <add>, %70, %cst_24 [1] : vector<8x8xf32> to vector<8xf32>
    %72 = vector.shape_cast %71 : vector<8xf32> to vector<8x1xf32>
    %73 = tpu.reciprocal %72 {approx = true} : vector<8x1xf32> -> vector<8x1xf32>
    %74 = vector.broadcast %73 : vector<8x1xf32> to vector<8x8xf32>
    %75 = arith.mulf %70, %74 : vector<8x8xf32>
    %76 = arith.truncf %75 : vector<8x8xf32> to vector<8x8xbf16>
    %77 = vector.extract_strided_slice %4 {offsets = [0, 16], sizes = [8, 8], strides = [1, 1]} : vector<8x32xf32> to vector<8x8xf32>
    %78 = arith.truncf %77 : vector<8x8xf32> to vector<8x8xbf16>
    %cst_25 = arith.constant dense<0.000000e+00> : vector<8x8xf32>
    %79 = tpu.matmul %76, %78, %cst_25 {dimension_numbers = #tpu.dot_dimension_numbers<[1], [0], [0], [1], [0, 0, 1, 1], [], []>} : vector<8x8xbf16>, vector<8x8xbf16>, vector<8x8xf32> -> vector<8x8xf32>
    %80 = arith.truncf %79 : vector<8x8xf32> to vector<8x8xbf16>
    %c2 = arith.constant 2 : index
    %c0_26 = arith.constant 0 : index
    %c0_27 = arith.constant 0 : index
    %81 = vector.load %arg2[%c2, %c0_26, %c0_27] : memref<4x8x32xbf16, #tpu.memory_space<vmem>>, vector<1x8x32xbf16>
    %82 = vector.shape_cast %81 : vector<1x8x32xbf16> to vector<8x32xbf16>
    %cst_28 = arith.constant dense<0.000000e+00> : vector<8x32xf32>
    %83 = tpu.matmul %80, %82, %cst_28 {dimension_numbers = #tpu.dot_dimension_numbers<[1], [0], [0], [1], [0, 0, 1, 1], [], []>} : vector<8x8xbf16>, vector<8x32xbf16>, vector<8x32xf32> -> vector<8x32xf32>
    %84 = arith.addf %58, %83 : vector<8x32xf32>
    %85 = vector.extract_strided_slice %2 {offsets = [0, 24], sizes = [8, 8], strides = [1, 1]} : vector<8x32xf32> to vector<8x8xf32>
    %86 = arith.truncf %85 : vector<8x8xf32> to vector<8x8xbf16>
    %87 = vector.extract_strided_slice %3 {offsets = [0, 24], sizes = [8, 8], strides = [1, 1]} : vector<8x32xf32> to vector<8x8xf32>
    %88 = arith.truncf %87 : vector<8x8xf32> to vector<8x8xbf16>
    %cst_29 = arith.constant dense<0.000000e+00> : vector<8x8xf32>
    %89 = tpu.matmul %86, %88, %cst_29 {dimension_numbers = #tpu.dot_dimension_numbers<[1], [1], [0], [0], [0, 0, 1, 0], [], []>} : vector<8x8xbf16>, vector<8x8xbf16>, vector<8x8xf32> -> vector<8x8xf32>
    %cst_30 = arith.constant 0.353553385 : f32
    %90 = vector.broadcast %cst_30 : f32 to vector<8x8xf32>
    %91 = arith.mulf %89, %90 : vector<8x8xf32>
    %cst_31 = arith.constant dense<0xFF800000> : vector<8xf32>
    %92 = vector.multi_reduction <maximumf>, %91, %cst_31 [1] : vector<8x8xf32> to vector<8xf32>
    %93 = vector.shape_cast %92 : vector<8xf32> to vector<8x1xf32>
    %94 = vector.broadcast %93 : vector<8x1xf32> to vector<8x8xf32>
    %95 = arith.subf %91, %94 : vector<8x8xf32>
    %96 = math.exp %95 : vector<8x8xf32>
    %cst_32 = arith.constant dense<0.000000e+00> : vector<8xf32>
    %97 = vector.multi_reduction <add>, %96, %cst_32 [1] : vector<8x8xf32> to vector<8xf32>
    %98 = vector.shape_cast %97 : vector<8xf32> to vector<8x1xf32>
    %99 = tpu.reciprocal %98 {approx = true} : vector<8x1xf32> -> vector<8x1xf32>
    %100 = vector.broadcast %99 : vector<8x1xf32> to vector<8x8xf32>
    %101 = arith.mulf %96, %100 : vector<8x8xf32>
    %102 = arith.truncf %101 : vector<8x8xf32> to vector<8x8xbf16>
    %103 = vector.extract_strided_slice %4 {offsets = [0, 24], sizes = [8, 8], strides = [1, 1]} : vector<8x32xf32> to vector<8x8xf32>
    %104 = arith.truncf %103 : vector<8x8xf32> to vector<8x8xbf16>
    %cst_33 = arith.constant dense<0.000000e+00> : vector<8x8xf32>
    %105 = tpu.matmul %102, %104, %cst_33 {dimension_numbers = #tpu.dot_dimension_numbers<[1], [0], [0], [1], [0, 0, 1, 1], [], []>} : vector<8x8xbf16>, vector<8x8xbf16>, vector<8x8xf32> -> vector<8x8xf32>
    %106 = arith.truncf %105 : vector<8x8xf32> to vector<8x8xbf16>
    %c3 = arith.constant 3 : index
    %c0_34 = arith.constant 0 : index
    %c0_35 = arith.constant 0 : index
    %107 = vector.load %arg2[%c3, %c0_34, %c0_35] : memref<4x8x32xbf16, #tpu.memory_space<vmem>>, vector<1x8x32xbf16>
    %108 = vector.shape_cast %107 : vector<1x8x32xbf16> to vector<8x32xbf16>
    %cst_36 = arith.constant dense<0.000000e+00> : vector<8x32xf32>
    %109 = tpu.matmul %106, %108, %cst_36 {dimension_numbers = #tpu.dot_dimension_numbers<[1], [0], [0], [1], [0, 0, 1, 1], [], []>} : vector<8x8xbf16>, vector<8x32xbf16>, vector<8x32xf32> -> vector<8x32xf32>
    %110 = arith.addf %84, %109 : vector<8x32xf32>
    %c0_37 = arith.constant 0 : index
    %c0_38 = arith.constant 0 : index
    %c0_39 = arith.constant 0 : index
    %111 = vector.load %arg4[%c0_37, %c0_38, %c0_39] : memref<1x8x32xf32, #tpu.memory_space<vmem>>, vector<1x8x32xf32>
    %112 = vector.shape_cast %111 : vector<1x8x32xf32> to vector<8x32xf32>
    %113 = vector.shape_cast %110 : vector<8x32xf32> to vector<1x8x32xf32>
    tpu.vector_store %arg4[%c0_37, %c0_38, %c0_39], %113 {strides = array<i32>} : memref<1x8x32xf32, #tpu.memory_space<vmem>>, vector<1x8x32xf32>,
    return
  }
  func.func @transform_0(%arg0: i32) -> (i32, i32, i32) {
    %c0_i32 = arith.constant 0 : i32
    %c0_i32_0 = arith.constant 0 : i32
    %c0_i32_1 = arith.constant 0 : i32
    return %arg0, %c0_i32, %c0_i32_0 : i32, i32, i32
  }
  func.func @transform_1(%arg0: i32) -> (i32, i32, i32) {
    %c0_i32 = arith.constant 0 : i32
    %c0_i32_0 = arith.constant 0 : i32
    %c0_i32_1 = arith.constant 0 : i32
    %c0_i32_2 = arith.constant 0 : i32
    return %c0_i32, %c0_i32_0, %c0_i32_1 : i32, i32, i32
  }
  func.func @transform_2(%arg0: i32) -> (i32, i32, i32) {
    %c0_i32 = arith.constant 0 : i32
    %c0_i32_0 = arith.constant 0 : i32
    %c0_i32_1 = arith.constant 0 : i32
    return %arg0, %c0_i32, %c0_i32_0 : i32, i32, i32
  }
  func.func @transform_3(%arg0: i32) -> (i32, i32, i32) {
    %c0_i32 = arith.constant 0 : i32
    %c0_i32_0 = arith.constant 0 : i32
    %c0_i32_1 = arith.constant 0 : i32
    return %arg0, %c0_i32, %c0_i32_0 : i32, i32, i32
  }
}

module attributes {stable_mosaic.version = 11 : i64} {
  func.func @_ln_ffn_kernel(%arg0: i32, %arg1: memref<16x32xf32, #tpu.memory_space<vmem>>, %arg2: memref<1x32xf32, #tpu.memory_space<vmem>>, %arg3: memref<1x32xf32, #tpu.memory_space<vmem>>, %arg4: memref<32x128xbf16, #tpu.memory_space<vmem>>, %arg5: memref<128x32xbf16, #tpu.memory_space<vmem>>, %arg6: memref<16x32xf32, #tpu.memory_space<vmem>>) attributes {dimension_semantics = [#tpu.dimension_semantics<parallel>], iteration_bounds = array<i64: 1>, scalar_prefetch = 0 : i64, scratch_operands = 0 : i64, tpu.core_type = #tpu.core_type<tc>, window_params = [{transform_indices = @transform_0, window_bounds = array<i64: 16, 32>}, {pipeline_mode = #tpu.pipeline_mode<synchronous>, transform_indices = @transform_1, window_bounds = array<i64: 1, 32>}, {pipeline_mode = #tpu.pipeline_mode<synchronous>, transform_indices = @transform_2, window_bounds = array<i64: 1, 32>}, {pipeline_mode = #tpu.pipeline_mode<synchronous>, transform_indices = @transform_3, window_bounds = array<i64: 32, 128>}, {pipeline_mode = #tpu.pipeline_mode<synchronous>, transform_indices = @transform_4, window_bounds = array<i64: 128, 32>}, {transform_indices = @transform_5, window_bounds = array<i64: 16, 32>}]} {
    %c0 = arith.constant 0 : index
    %c0_0 = arith.constant 0 : index
    %0 = vector.load %arg1[%c0, %c0_0] : memref<16x32xf32, #tpu.memory_space<vmem>>, vector<16x32xf32>
    %c0_1 = arith.constant 0 : index
    %c0_2 = arith.constant 0 : index
    %1 = vector.load %arg2[%c0_1, %c0_2] : memref<1x32xf32, #tpu.memory_space<vmem>>, vector<1x32xf32>
    %c0_3 = arith.constant 0 : index
    %c0_4 = arith.constant 0 : index
    %2 = vector.load %arg3[%c0_3, %c0_4] : memref<1x32xf32, #tpu.memory_space<vmem>>, vector<1x32xf32>
    %cst = arith.constant dense<0.000000e+00> : vector<16xf32>
    %3 = vector.multi_reduction <add>, %0, %cst [1] : vector<16x32xf32> to vector<16xf32>
    %4 = vector.shape_cast %3 : vector<16xf32> to vector<16x1xf32>
    %cst_5 = arith.constant 3.200000e+01 : f32
    %5 = vector.broadcast %cst_5 : f32 to vector<16x1xf32>
    %6 = arith.divf %4, %5 : vector<16x1xf32>
    %7 = vector.broadcast %6 : vector<16x1xf32> to vector<16x32xf32>
    %8 = arith.subf %0, %7 : vector<16x32xf32>
    %9 = arith.mulf %8, %8 : vector<16x32xf32>
    %cst_6 = arith.constant dense<0.000000e+00> : vector<16xf32>
    %10 = vector.multi_reduction <add>, %9, %cst_6 [1] : vector<16x32xf32> to vector<16xf32>
    %11 = vector.shape_cast %10 : vector<16xf32> to vector<16x1xf32>
    %cst_7 = arith.constant 3.200000e+01 : f32
    %12 = vector.broadcast %cst_7 : f32 to vector<16x1xf32>
    %13 = arith.divf %11, %12 : vector<16x1xf32>
    %14 = vector.broadcast %6 : vector<16x1xf32> to vector<16x32xf32>
    %15 = arith.subf %0, %14 : vector<16x32xf32>
    %cst_8 = arith.constant 9.99999974E-6 : f32
    %16 = vector.broadcast %cst_8 : f32 to vector<16x1xf32>
    %17 = arith.addf %13, %16 : vector<16x1xf32>
    %18 = math.rsqrt %17 : vector<16x1xf32>
    %19 = vector.broadcast %18 : vector<16x1xf32> to vector<16x32xf32>
    %20 = arith.mulf %15, %19 : vector<16x32xf32>
    %21 = vector.broadcast %1 : vector<1x32xf32> to vector<16x32xf32>
    %22 = arith.mulf %20, %21 : vector<16x32xf32>
    %23 = vector.broadcast %2 : vector<1x32xf32> to vector<16x32xf32>
    %24 = arith.addf %22, %23 : vector<16x32xf32>
    %25 = arith.truncf %24 : vector<16x32xf32> to vector<16x32xbf16>
    %c0_9 = arith.constant 0 : index
    %c0_10 = arith.constant 0 : index
    %26 = vector.load %arg4[%c0_9, %c0_10] : memref<32x128xbf16, #tpu.memory_space<vmem>>, vector<32x128xbf16>
    %cst_11 = arith.constant dense<0.000000e+00> : vector<16x128xf32>
    %27 = tpu.matmul %25, %26, %cst_11 {dimension_numbers = #tpu.dot_dimension_numbers<[1], [0], [0], [1], [0, 0, 1, 1], [], []>} : vector<16x32xbf16>, vector<32x128xbf16>, vector<16x128xf32> -> vector<16x128xf32>
    %cst_12 = arith.constant 5.000000e-01 : f32
    %28 = vector.broadcast %cst_12 : f32 to vector<16x128xf32>
    %29 = arith.mulf %28, %27 : vector<16x128xf32>
    %cst_13 = arith.constant 0.707106769 : f32
    %30 = vector.broadcast %cst_13 : f32 to vector<16x128xf32>
    %31 = arith.mulf %27, %30 : vector<16x128xf32>
    %32 = math.erf %31 : vector<16x128xf32>
    %cst_14 = arith.constant 1.000000e+00 : f32
    %33 = vector.broadcast %cst_14 : f32 to vector<16x128xf32>
    %34 = arith.addf %33, %32 : vector<16x128xf32>
    %35 = arith.mulf %29, %34 : vector<16x128xf32>
    %36 = arith.truncf %35 : vector<16x128xf32> to vector<16x128xbf16>
    %c0_15 = arith.constant 0 : index
    %c0_16 = arith.constant 0 : index
    %37 = vector.load %arg5[%c0_15, %c0_16] : memref<128x32xbf16, #tpu.memory_space<vmem>>, vector<128x32xbf16>
    %cst_17 = arith.constant dense<0.000000e+00> : vector<16x32xf32>
    %38 = tpu.matmul %36, %37, %cst_17 {dimension_numbers = #tpu.dot_dimension_numbers<[1], [0], [0], [1], [0, 0, 1, 1], [], []>} : vector<16x128xbf16>, vector<128x32xbf16>, vector<16x32xf32> -> vector<16x32xf32>
    %39 = arith.addf %0, %38 : vector<16x32xf32>
    %c0_18 = arith.constant 0 : index
    %c0_19 = arith.constant 0 : index
    %40 = vector.load %arg6[%c0_18, %c0_19] : memref<16x32xf32, #tpu.memory_space<vmem>>, vector<16x32xf32>
    tpu.vector_store %arg6[%c0_18, %c0_19], %39 {strides = array<i32>} : memref<16x32xf32, #tpu.memory_space<vmem>>, vector<16x32xf32>,
    return
  }
  func.func @transform_0(%arg0: i32) -> (i32, i32) {
    %c0_i32 = arith.constant 0 : i32
    %c0_i32_0 = arith.constant 0 : i32
    return %arg0, %c0_i32 : i32, i32
  }
  func.func @transform_1(%arg0: i32) -> (i32, i32) {
    %c0_i32 = arith.constant 0 : i32
    %c0_i32_0 = arith.constant 0 : i32
    %c0_i32_1 = arith.constant 0 : i32
    return %c0_i32, %c0_i32_0 : i32, i32
  }
  func.func @transform_2(%arg0: i32) -> (i32, i32) {
    %c0_i32 = arith.constant 0 : i32
    %c0_i32_0 = arith.constant 0 : i32
    %c0_i32_1 = arith.constant 0 : i32
    return %c0_i32, %c0_i32_0 : i32, i32
  }
  func.func @transform_3(%arg0: i32) -> (i32, i32) {
    %c0_i32 = arith.constant 0 : i32
    %c0_i32_0 = arith.constant 0 : i32
    %c0_i32_1 = arith.constant 0 : i32
    return %c0_i32, %c0_i32_0 : i32, i32
  }
  func.func @transform_4(%arg0: i32) -> (i32, i32) {
    %c0_i32 = arith.constant 0 : i32
    %c0_i32_0 = arith.constant 0 : i32
    %c0_i32_1 = arith.constant 0 : i32
    return %c0_i32, %c0_i32_0 : i32, i32
  }
  func.func @transform_5(%arg0: i32) -> (i32, i32) {
    %c0_i32 = arith.constant 0 : i32
    %c0_i32_0 = arith.constant 0 : i32
    return %arg0, %c0_i32 : i32, i32
  }
}

module attributes {stable_mosaic.version = 11 : i64} {
  func.func @_linear_bias_kernel(%arg0: i32, %arg1: i32, %arg2: i32, %arg3: memref<16x32xf32, #tpu.memory_space<vmem>>, %arg4: memref<32x16xbf16, #tpu.memory_space<vmem>>, %arg5: memref<1x16xf32, #tpu.memory_space<vmem>>, %arg6: memref<16x16xf32, #tpu.memory_space<vmem>>, %arg7: memref<16x16xf32, #tpu.memory_space<vmem>>) attributes {dimension_semantics = [#tpu.dimension_semantics<parallel>, #tpu.dimension_semantics<parallel>, #tpu.dimension_semantics<arbitrary>], iteration_bounds = array<i64: 1, 1, 1>, scalar_prefetch = 0 : i64, scratch_operands = 1 : i64, tpu.core_type = #tpu.core_type<tc>, window_params = [{transform_indices = @transform_0, window_bounds = array<i64: 16, 32>}, {transform_indices = @transform_1, window_bounds = array<i64: 32, 16>}, {transform_indices = @transform_2, window_bounds = array<i64: 1, 16>}, {transform_indices = @transform_3, window_bounds = array<i64: 16, 16>}]} {
    %c0_i32 = arith.constant 0 : i32
    %0 = arith.cmpi eq, %arg2, %c0_i32 : i32
    %1 = arith.extui %0 : i1 to i32
    %c0_i32_0 = arith.constant 0 : i32
    %2 = arith.cmpi ne, %1, %c0_i32_0 : i32
    scf.if %2 {
      %cst_10 = arith.constant 0.000000e+00 : f32
      %13 = vector.broadcast %cst_10 : f32 to vector<16x16xf32>
      %c0_11 = arith.constant 0 : index
      %c0_12 = arith.constant 0 : index
      %14 = vector.load %arg7[%c0_11, %c0_12] : memref<16x16xf32, #tpu.memory_space<vmem>>, vector<16x16xf32>
      tpu.vector_store %arg7[%c0_11, %c0_12], %13 {strides = array<i32>} : memref<16x16xf32, #tpu.memory_space<vmem>>, vector<16x16xf32>,
    } else {
    }
    %c0 = arith.constant 0 : index
    %c0_1 = arith.constant 0 : index
    %3 = vector.load %arg7[%c0, %c0_1] : memref<16x16xf32, #tpu.memory_space<vmem>>, vector<16x16xf32>
    %c0_2 = arith.constant 0 : index
    %c0_3 = arith.constant 0 : index
    %4 = vector.load %arg3[%c0_2, %c0_3] : memref<16x32xf32, #tpu.memory_space<vmem>>, vector<16x32xf32>
    %5 = arith.truncf %4 : vector<16x32xf32> to vector<16x32xbf16>
    %c0_4 = arith.constant 0 : index
    %c0_5 = arith.constant 0 : index
    %6 = vector.load %arg4[%c0_4, %c0_5] : memref<32x16xbf16, #tpu.memory_space<vmem>>, vector<32x16xbf16>
    %cst = arith.constant dense<0.000000e+00> : vector<16x16xf32>
    %7 = tpu.matmul %5, %6, %cst {dimension_numbers = #tpu.dot_dimension_numbers<[1], [0], [0], [1], [0, 0, 1, 1], [], []>} : vector<16x32xbf16>, vector<32x16xbf16>, vector<16x16xf32> -> vector<16x16xf32>
    %8 = arith.addf %3, %7 : vector<16x16xf32>
    %c0_6 = arith.constant 0 : index
    %c0_7 = arith.constant 0 : index
    %9 = vector.load %arg7[%c0_6, %c0_7] : memref<16x16xf32, #tpu.memory_space<vmem>>, vector<16x16xf32>
    tpu.vector_store %arg7[%c0_6, %c0_7], %8 {strides = array<i32>} : memref<16x16xf32, #tpu.memory_space<vmem>>, vector<16x16xf32>,
    %c0_i32_8 = arith.constant 0 : i32
    %10 = arith.cmpi eq, %arg2, %c0_i32_8 : i32
    %11 = arith.extui %10 : i1 to i32
    %c0_i32_9 = arith.constant 0 : i32
    %12 = arith.cmpi ne, %11, %c0_i32_9 : i32
    scf.if %12 {
      %c0_10 = arith.constant 0 : index
      %c0_11 = arith.constant 0 : index
      %13 = vector.load %arg7[%c0_10, %c0_11] : memref<16x16xf32, #tpu.memory_space<vmem>>, vector<16x16xf32>
      %c0_12 = arith.constant 0 : index
      %c0_13 = arith.constant 0 : index
      %14 = vector.load %arg5[%c0_12, %c0_13] : memref<1x16xf32, #tpu.memory_space<vmem>>, vector<1x16xf32>
      %15 = vector.broadcast %14 : vector<1x16xf32> to vector<16x16xf32>
      %16 = arith.addf %13, %15 : vector<16x16xf32>
      %c0_14 = arith.constant 0 : index
      %c0_15 = arith.constant 0 : index
      %17 = vector.load %arg6[%c0_14, %c0_15] : memref<16x16xf32, #tpu.memory_space<vmem>>, vector<16x16xf32>
      tpu.vector_store %arg6[%c0_14, %c0_15], %16 {strides = array<i32>} : memref<16x16xf32, #tpu.memory_space<vmem>>, vector<16x16xf32>,
    } else {
    }
    return
  }
  func.func @transform_0(%arg0: i32, %arg1: i32, %arg2: i32) -> (i32, i32) {
    %c0_i32 = arith.constant 0 : i32
    return %arg0, %arg2 : i32, i32
  }
  func.func @transform_1(%arg0: i32, %arg1: i32, %arg2: i32) -> (i32, i32) {
    %c0_i32 = arith.constant 0 : i32
    return %arg2, %arg1 : i32, i32
  }
  func.func @transform_2(%arg0: i32, %arg1: i32, %arg2: i32) -> (i32, i32) {
    %c0_i32 = arith.constant 0 : i32
    %c0_i32_0 = arith.constant 0 : i32
    return %c0_i32, %arg1 : i32, i32
  }
  func.func @transform_3(%arg0: i32, %arg1: i32, %arg2: i32) -> (i32, i32) {
    %c0_i32 = arith.constant 0 : i32
    return %arg0, %arg1 : i32, i32
  }
}

module attributes {stable_mosaic.version = 11 : i64} {
  func.func @_cross_attn_kernel(%arg0: i32, %arg1: memref<1x8x32xf32, #tpu.memory_space<vmem>>, %arg2: memref<1x8x32xf32, #tpu.memory_space<vmem>>, %arg3: memref<1x32xf32, #tpu.memory_space<vmem>>, %arg4: memref<1x32xf32, #tpu.memory_space<vmem>>, %arg5: memref<1x32xf32, #tpu.memory_space<vmem>>, %arg6: memref<1x32xf32, #tpu.memory_space<vmem>>, %arg7: memref<4x8x32xbf16, #tpu.memory_space<vmem>>, %arg8: memref<1x8x32xf32, #tpu.memory_space<vmem>>) attributes {dimension_semantics = [#tpu.dimension_semantics<parallel>], iteration_bounds = array<i64: 2>, scalar_prefetch = 0 : i64, scratch_operands = 0 : i64, tpu.core_type = #tpu.core_type<tc>, window_params = [{transform_indices = @transform_0, window_bounds = array<i64: 1, 8, 32>}, {transform_indices = @transform_1, window_bounds = array<i64: 1, 8, 32>}, {pipeline_mode = #tpu.pipeline_mode<synchronous>, transform_indices = @transform_2, window_bounds = array<i64: 1, 32>}, {pipeline_mode = #tpu.pipeline_mode<synchronous>, transform_indices = @transform_3, window_bounds = array<i64: 1, 32>}, {pipeline_mode = #tpu.pipeline_mode<synchronous>, transform_indices = @transform_4, window_bounds = array<i64: 1, 32>}, {pipeline_mode = #tpu.pipeline_mode<synchronous>, transform_indices = @transform_5, window_bounds = array<i64: 1, 32>}, {pipeline_mode = #tpu.pipeline_mode<synchronous>, transform_indices = @transform_6, window_bounds = array<i64: 4, 8, 32>}, {transform_indices = @transform_7, window_bounds = array<i64: 1, 8, 32>}]} {
    %c0 = arith.constant 0 : index
    %c0_0 = arith.constant 0 : index
    %c0_1 = arith.constant 0 : index
    %0 = vector.load %arg1[%c0, %c0_0, %c0_1] : memref<1x8x32xf32, #tpu.memory_space<vmem>>, vector<1x8x32xf32>
    %1 = vector.shape_cast %0 : vector<1x8x32xf32> to vector<8x32xf32>
    %c0_2 = arith.constant 0 : index
    %c0_3 = arith.constant 0 : index
    %2 = vector.load %arg3[%c0_2, %c0_3] : memref<1x32xf32, #tpu.memory_space<vmem>>, vector<1x32xf32>
    %c0_4 = arith.constant 0 : index
    %c0_5 = arith.constant 0 : index
    %3 = vector.load %arg4[%c0_4, %c0_5] : memref<1x32xf32, #tpu.memory_space<vmem>>, vector<1x32xf32>
    %cst = arith.constant dense<0.000000e+00> : vector<8xf32>
    %4 = vector.multi_reduction <add>, %1, %cst [1] : vector<8x32xf32> to vector<8xf32>
    %5 = vector.shape_cast %4 : vector<8xf32> to vector<8x1xf32>
    %cst_6 = arith.constant 3.200000e+01 : f32
    %6 = vector.broadcast %cst_6 : f32 to vector<8x1xf32>
    %7 = arith.divf %5, %6 : vector<8x1xf32>
    %8 = vector.broadcast %7 : vector<8x1xf32> to vector<8x32xf32>
    %9 = arith.subf %1, %8 : vector<8x32xf32>
    %10 = arith.mulf %9, %9 : vector<8x32xf32>
    %cst_7 = arith.constant dense<0.000000e+00> : vector<8xf32>
    %11 = vector.multi_reduction <add>, %10, %cst_7 [1] : vector<8x32xf32> to vector<8xf32>
    %12 = vector.shape_cast %11 : vector<8xf32> to vector<8x1xf32>
    %cst_8 = arith.constant 3.200000e+01 : f32
    %13 = vector.broadcast %cst_8 : f32 to vector<8x1xf32>
    %14 = arith.divf %12, %13 : vector<8x1xf32>
    %15 = vector.broadcast %7 : vector<8x1xf32> to vector<8x32xf32>
    %16 = arith.subf %1, %15 : vector<8x32xf32>
    %cst_9 = arith.constant 9.99999974E-6 : f32
    %17 = vector.broadcast %cst_9 : f32 to vector<8x1xf32>
    %18 = arith.addf %14, %17 : vector<8x1xf32>
    %19 = math.rsqrt %18 : vector<8x1xf32>
    %20 = vector.broadcast %19 : vector<8x1xf32> to vector<8x32xf32>
    %21 = arith.mulf %16, %20 : vector<8x32xf32>
    %22 = vector.broadcast %2 : vector<1x32xf32> to vector<8x32xf32>
    %23 = arith.mulf %21, %22 : vector<8x32xf32>
    %24 = vector.broadcast %3 : vector<1x32xf32> to vector<8x32xf32>
    %25 = arith.addf %23, %24 : vector<8x32xf32>
    %c0_10 = arith.constant 0 : index
    %c0_11 = arith.constant 0 : index
    %c0_12 = arith.constant 0 : index
    %26 = vector.load %arg2[%c0_10, %c0_11, %c0_12] : memref<1x8x32xf32, #tpu.memory_space<vmem>>, vector<1x8x32xf32>
    %27 = vector.shape_cast %26 : vector<1x8x32xf32> to vector<8x32xf32>
    %c0_13 = arith.constant 0 : index
    %c0_14 = arith.constant 0 : index
    %28 = vector.load %arg5[%c0_13, %c0_14] : memref<1x32xf32, #tpu.memory_space<vmem>>, vector<1x32xf32>
    %c0_15 = arith.constant 0 : index
    %c0_16 = arith.constant 0 : index
    %29 = vector.load %arg6[%c0_15, %c0_16] : memref<1x32xf32, #tpu.memory_space<vmem>>, vector<1x32xf32>
    %cst_17 = arith.constant dense<0.000000e+00> : vector<8xf32>
    %30 = vector.multi_reduction <add>, %27, %cst_17 [1] : vector<8x32xf32> to vector<8xf32>
    %31 = vector.shape_cast %30 : vector<8xf32> to vector<8x1xf32>
    %cst_18 = arith.constant 3.200000e+01 : f32
    %32 = vector.broadcast %cst_18 : f32 to vector<8x1xf32>
    %33 = arith.divf %31, %32 : vector<8x1xf32>
    %34 = vector.broadcast %33 : vector<8x1xf32> to vector<8x32xf32>
    %35 = arith.subf %27, %34 : vector<8x32xf32>
    %36 = arith.mulf %35, %35 : vector<8x32xf32>
    %cst_19 = arith.constant dense<0.000000e+00> : vector<8xf32>
    %37 = vector.multi_reduction <add>, %36, %cst_19 [1] : vector<8x32xf32> to vector<8xf32>
    %38 = vector.shape_cast %37 : vector<8xf32> to vector<8x1xf32>
    %cst_20 = arith.constant 3.200000e+01 : f32
    %39 = vector.broadcast %cst_20 : f32 to vector<8x1xf32>
    %40 = arith.divf %38, %39 : vector<8x1xf32>
    %41 = vector.broadcast %33 : vector<8x1xf32> to vector<8x32xf32>
    %42 = arith.subf %27, %41 : vector<8x32xf32>
    %cst_21 = arith.constant 9.99999974E-6 : f32
    %43 = vector.broadcast %cst_21 : f32 to vector<8x1xf32>
    %44 = arith.addf %40, %43 : vector<8x1xf32>
    %45 = math.rsqrt %44 : vector<8x1xf32>
    %46 = vector.broadcast %45 : vector<8x1xf32> to vector<8x32xf32>
    %47 = arith.mulf %42, %46 : vector<8x32xf32>
    %48 = vector.broadcast %28 : vector<1x32xf32> to vector<8x32xf32>
    %49 = arith.mulf %47, %48 : vector<8x32xf32>
    %50 = vector.broadcast %29 : vector<1x32xf32> to vector<8x32xf32>
    %51 = arith.addf %49, %50 : vector<8x32xf32>
    %52 = vector.extract_strided_slice %25 {offsets = [0, 0], sizes = [8, 8], strides = [1, 1]} : vector<8x32xf32> to vector<8x8xf32>
    %53 = arith.truncf %52 : vector<8x8xf32> to vector<8x8xbf16>
    %54 = vector.extract_strided_slice %51 {offsets = [0, 0], sizes = [8, 8], strides = [1, 1]} : vector<8x32xf32> to vector<8x8xf32>
    %55 = arith.truncf %54 : vector<8x8xf32> to vector<8x8xbf16>
    %cst_22 = arith.constant dense<0.000000e+00> : vector<8x8xf32>
    %56 = tpu.matmul %53, %55, %cst_22 {dimension_numbers = #tpu.dot_dimension_numbers<[1], [1], [0], [0], [0, 0, 1, 0], [], []>} : vector<8x8xbf16>, vector<8x8xbf16>, vector<8x8xf32> -> vector<8x8xf32>
    %cst_23 = arith.constant 0.353553385 : f32
    %57 = vector.broadcast %cst_23 : f32 to vector<8x8xf32>
    %58 = arith.mulf %56, %57 : vector<8x8xf32>
    %cst_24 = arith.constant dense<0xFF800000> : vector<8xf32>
    %59 = vector.multi_reduction <maximumf>, %58, %cst_24 [1] : vector<8x8xf32> to vector<8xf32>
    %60 = vector.shape_cast %59 : vector<8xf32> to vector<8x1xf32>
    %61 = vector.broadcast %60 : vector<8x1xf32> to vector<8x8xf32>
    %62 = arith.subf %58, %61 : vector<8x8xf32>
    %63 = math.exp %62 : vector<8x8xf32>
    %cst_25 = arith.constant dense<0.000000e+00> : vector<8xf32>
    %64 = vector.multi_reduction <add>, %63, %cst_25 [1] : vector<8x8xf32> to vector<8xf32>
    %65 = vector.shape_cast %64 : vector<8xf32> to vector<8x1xf32>
    %66 = tpu.reciprocal %65 {approx = true} : vector<8x1xf32> -> vector<8x1xf32>
    %67 = vector.broadcast %66 : vector<8x1xf32> to vector<8x8xf32>
    %68 = arith.mulf %63, %67 : vector<8x8xf32>
    %69 = arith.truncf %68 : vector<8x8xf32> to vector<8x8xbf16>
    %70 = vector.extract_strided_slice %51 {offsets = [0, 0], sizes = [8, 8], strides = [1, 1]} : vector<8x32xf32> to vector<8x8xf32>
    %71 = arith.truncf %70 : vector<8x8xf32> to vector<8x8xbf16>
    %cst_26 = arith.constant dense<0.000000e+00> : vector<8x8xf32>
    %72 = tpu.matmul %69, %71, %cst_26 {dimension_numbers = #tpu.dot_dimension_numbers<[1], [0], [0], [1], [0, 0, 1, 1], [], []>} : vector<8x8xbf16>, vector<8x8xbf16>, vector<8x8xf32> -> vector<8x8xf32>
    %73 = arith.truncf %72 : vector<8x8xf32> to vector<8x8xbf16>
    %c0_27 = arith.constant 0 : index
    %c0_28 = arith.constant 0 : index
    %c0_29 = arith.constant 0 : index
    %74 = vector.load %arg7[%c0_27, %c0_28, %c0_29] : memref<4x8x32xbf16, #tpu.memory_space<vmem>>, vector<1x8x32xbf16>
    %75 = vector.shape_cast %74 : vector<1x8x32xbf16> to vector<8x32xbf16>
    %cst_30 = arith.constant dense<0.000000e+00> : vector<8x32xf32>
    %76 = tpu.matmul %73, %75, %cst_30 {dimension_numbers = #tpu.dot_dimension_numbers<[1], [0], [0], [1], [0, 0, 1, 1], [], []>} : vector<8x8xbf16>, vector<8x32xbf16>, vector<8x32xf32> -> vector<8x32xf32>
    %77 = arith.addf %1, %76 : vector<8x32xf32>
    %78 = vector.extract_strided_slice %25 {offsets = [0, 8], sizes = [8, 8], strides = [1, 1]} : vector<8x32xf32> to vector<8x8xf32>
    %79 = arith.truncf %78 : vector<8x8xf32> to vector<8x8xbf16>
    %80 = vector.extract_strided_slice %51 {offsets = [0, 8], sizes = [8, 8], strides = [1, 1]} : vector<8x32xf32> to vector<8x8xf32>
    %81 = arith.truncf %80 : vector<8x8xf32> to vector<8x8xbf16>
    %cst_31 = arith.constant dense<0.000000e+00> : vector<8x8xf32>
    %82 = tpu.matmul %79, %81, %cst_31 {dimension_numbers = #tpu.dot_dimension_numbers<[1], [1], [0], [0], [0, 0, 1, 0], [], []>} : vector<8x8xbf16>, vector<8x8xbf16>, vector<8x8xf32> -> vector<8x8xf32>
    %cst_32 = arith.constant 0.353553385 : f32
    %83 = vector.broadcast %cst_32 : f32 to vector<8x8xf32>
    %84 = arith.mulf %82, %83 : vector<8x8xf32>
    %cst_33 = arith.constant dense<0xFF800000> : vector<8xf32>
    %85 = vector.multi_reduction <maximumf>, %84, %cst_33 [1] : vector<8x8xf32> to vector<8xf32>
    %86 = vector.shape_cast %85 : vector<8xf32> to vector<8x1xf32>
    %87 = vector.broadcast %86 : vector<8x1xf32> to vector<8x8xf32>
    %88 = arith.subf %84, %87 : vector<8x8xf32>
    %89 = math.exp %88 : vector<8x8xf32>
    %cst_34 = arith.constant dense<0.000000e+00> : vector<8xf32>
    %90 = vector.multi_reduction <add>, %89, %cst_34 [1] : vector<8x8xf32> to vector<8xf32>
    %91 = vector.shape_cast %90 : vector<8xf32> to vector<8x1xf32>
    %92 = tpu.reciprocal %91 {approx = true} : vector<8x1xf32> -> vector<8x1xf32>
    %93 = vector.broadcast %92 : vector<8x1xf32> to vector<8x8xf32>
    %94 = arith.mulf %89, %93 : vector<8x8xf32>
    %95 = arith.truncf %94 : vector<8x8xf32> to vector<8x8xbf16>
    %96 = vector.extract_strided_slice %51 {offsets = [0, 8], sizes = [8, 8], strides = [1, 1]} : vector<8x32xf32> to vector<8x8xf32>
    %97 = arith.truncf %96 : vector<8x8xf32> to vector<8x8xbf16>
    %cst_35 = arith.constant dense<0.000000e+00> : vector<8x8xf32>
    %98 = tpu.matmul %95, %97, %cst_35 {dimension_numbers = #tpu.dot_dimension_numbers<[1], [0], [0], [1], [0, 0, 1, 1], [], []>} : vector<8x8xbf16>, vector<8x8xbf16>, vector<8x8xf32> -> vector<8x8xf32>
    %99 = arith.truncf %98 : vector<8x8xf32> to vector<8x8xbf16>
    %c1 = arith.constant 1 : index
    %c0_36 = arith.constant 0 : index
    %c0_37 = arith.constant 0 : index
    %100 = vector.load %arg7[%c1, %c0_36, %c0_37] : memref<4x8x32xbf16, #tpu.memory_space<vmem>>, vector<1x8x32xbf16>
    %101 = vector.shape_cast %100 : vector<1x8x32xbf16> to vector<8x32xbf16>
    %cst_38 = arith.constant dense<0.000000e+00> : vector<8x32xf32>
    %102 = tpu.matmul %99, %101, %cst_38 {dimension_numbers = #tpu.dot_dimension_numbers<[1], [0], [0], [1], [0, 0, 1, 1], [], []>} : vector<8x8xbf16>, vector<8x32xbf16>, vector<8x32xf32> -> vector<8x32xf32>
    %103 = arith.addf %77, %102 : vector<8x32xf32>
    %104 = vector.extract_strided_slice %25 {offsets = [0, 16], sizes = [8, 8], strides = [1, 1]} : vector<8x32xf32> to vector<8x8xf32>
    %105 = arith.truncf %104 : vector<8x8xf32> to vector<8x8xbf16>
    %106 = vector.extract_strided_slice %51 {offsets = [0, 16], sizes = [8, 8], strides = [1, 1]} : vector<8x32xf32> to vector<8x8xf32>
    %107 = arith.truncf %106 : vector<8x8xf32> to vector<8x8xbf16>
    %cst_39 = arith.constant dense<0.000000e+00> : vector<8x8xf32>
    %108 = tpu.matmul %105, %107, %cst_39 {dimension_numbers = #tpu.dot_dimension_numbers<[1], [1], [0], [0], [0, 0, 1, 0], [], []>} : vector<8x8xbf16>, vector<8x8xbf16>, vector<8x8xf32> -> vector<8x8xf32>
    %cst_40 = arith.constant 0.353553385 : f32
    %109 = vector.broadcast %cst_40 : f32 to vector<8x8xf32>
    %110 = arith.mulf %108, %109 : vector<8x8xf32>
    %cst_41 = arith.constant dense<0xFF800000> : vector<8xf32>
    %111 = vector.multi_reduction <maximumf>, %110, %cst_41 [1] : vector<8x8xf32> to vector<8xf32>
    %112 = vector.shape_cast %111 : vector<8xf32> to vector<8x1xf32>
    %113 = vector.broadcast %112 : vector<8x1xf32> to vector<8x8xf32>
    %114 = arith.subf %110, %113 : vector<8x8xf32>
    %115 = math.exp %114 : vector<8x8xf32>
    %cst_42 = arith.constant dense<0.000000e+00> : vector<8xf32>
    %116 = vector.multi_reduction <add>, %115, %cst_42 [1] : vector<8x8xf32> to vector<8xf32>
    %117 = vector.shape_cast %116 : vector<8xf32> to vector<8x1xf32>
    %118 = tpu.reciprocal %117 {approx = true} : vector<8x1xf32> -> vector<8x1xf32>
    %119 = vector.broadcast %118 : vector<8x1xf32> to vector<8x8xf32>
    %120 = arith.mulf %115, %119 : vector<8x8xf32>
    %121 = arith.truncf %120 : vector<8x8xf32> to vector<8x8xbf16>
    %122 = vector.extract_strided_slice %51 {offsets = [0, 16], sizes = [8, 8], strides = [1, 1]} : vector<8x32xf32> to vector<8x8xf32>
    %123 = arith.truncf %122 : vector<8x8xf32> to vector<8x8xbf16>
    %cst_43 = arith.constant dense<0.000000e+00> : vector<8x8xf32>
    %124 = tpu.matmul %121, %123, %cst_43 {dimension_numbers = #tpu.dot_dimension_numbers<[1], [0], [0], [1], [0, 0, 1, 1], [], []>} : vector<8x8xbf16>, vector<8x8xbf16>, vector<8x8xf32> -> vector<8x8xf32>
    %125 = arith.truncf %124 : vector<8x8xf32> to vector<8x8xbf16>
    %c2 = arith.constant 2 : index
    %c0_44 = arith.constant 0 : index
    %c0_45 = arith.constant 0 : index
    %126 = vector.load %arg7[%c2, %c0_44, %c0_45] : memref<4x8x32xbf16, #tpu.memory_space<vmem>>, vector<1x8x32xbf16>
    %127 = vector.shape_cast %126 : vector<1x8x32xbf16> to vector<8x32xbf16>
    %cst_46 = arith.constant dense<0.000000e+00> : vector<8x32xf32>
    %128 = tpu.matmul %125, %127, %cst_46 {dimension_numbers = #tpu.dot_dimension_numbers<[1], [0], [0], [1], [0, 0, 1, 1], [], []>} : vector<8x8xbf16>, vector<8x32xbf16>, vector<8x32xf32> -> vector<8x32xf32>
    %129 = arith.addf %103, %128 : vector<8x32xf32>
    %130 = vector.extract_strided_slice %25 {offsets = [0, 24], sizes = [8, 8], strides = [1, 1]} : vector<8x32xf32> to vector<8x8xf32>
    %131 = arith.truncf %130 : vector<8x8xf32> to vector<8x8xbf16>
    %132 = vector.extract_strided_slice %51 {offsets = [0, 24], sizes = [8, 8], strides = [1, 1]} : vector<8x32xf32> to vector<8x8xf32>
    %133 = arith.truncf %132 : vector<8x8xf32> to vector<8x8xbf16>
    %cst_47 = arith.constant dense<0.000000e+00> : vector<8x8xf32>
    %134 = tpu.matmul %131, %133, %cst_47 {dimension_numbers = #tpu.dot_dimension_numbers<[1], [1], [0], [0], [0, 0, 1, 0], [], []>} : vector<8x8xbf16>, vector<8x8xbf16>, vector<8x8xf32> -> vector<8x8xf32>
    %cst_48 = arith.constant 0.353553385 : f32
    %135 = vector.broadcast %cst_48 : f32 to vector<8x8xf32>
    %136 = arith.mulf %134, %135 : vector<8x8xf32>
    %cst_49 = arith.constant dense<0xFF800000> : vector<8xf32>
    %137 = vector.multi_reduction <maximumf>, %136, %cst_49 [1] : vector<8x8xf32> to vector<8xf32>
    %138 = vector.shape_cast %137 : vector<8xf32> to vector<8x1xf32>
    %139 = vector.broadcast %138 : vector<8x1xf32> to vector<8x8xf32>
    %140 = arith.subf %136, %139 : vector<8x8xf32>
    %141 = math.exp %140 : vector<8x8xf32>
    %cst_50 = arith.constant dense<0.000000e+00> : vector<8xf32>
    %142 = vector.multi_reduction <add>, %141, %cst_50 [1] : vector<8x8xf32> to vector<8xf32>
    %143 = vector.shape_cast %142 : vector<8xf32> to vector<8x1xf32>
    %144 = tpu.reciprocal %143 {approx = true} : vector<8x1xf32> -> vector<8x1xf32>
    %145 = vector.broadcast %144 : vector<8x1xf32> to vector<8x8xf32>
    %146 = arith.mulf %141, %145 : vector<8x8xf32>
    %147 = arith.truncf %146 : vector<8x8xf32> to vector<8x8xbf16>
    %148 = vector.extract_strided_slice %51 {offsets = [0, 24], sizes = [8, 8], strides = [1, 1]} : vector<8x32xf32> to vector<8x8xf32>
    %149 = arith.truncf %148 : vector<8x8xf32> to vector<8x8xbf16>
    %cst_51 = arith.constant dense<0.000000e+00> : vector<8x8xf32>
    %150 = tpu.matmul %147, %149, %cst_51 {dimension_numbers = #tpu.dot_dimension_numbers<[1], [0], [0], [1], [0, 0, 1, 1], [], []>} : vector<8x8xbf16>, vector<8x8xbf16>, vector<8x8xf32> -> vector<8x8xf32>
    %151 = arith.truncf %150 : vector<8x8xf32> to vector<8x8xbf16>
    %c3 = arith.constant 3 : index
    %c0_52 = arith.constant 0 : index
    %c0_53 = arith.constant 0 : index
    %152 = vector.load %arg7[%c3, %c0_52, %c0_53] : memref<4x8x32xbf16, #tpu.memory_space<vmem>>, vector<1x8x32xbf16>
    %153 = vector.shape_cast %152 : vector<1x8x32xbf16> to vector<8x32xbf16>
    %cst_54 = arith.constant dense<0.000000e+00> : vector<8x32xf32>
    %154 = tpu.matmul %151, %153, %cst_54 {dimension_numbers = #tpu.dot_dimension_numbers<[1], [0], [0], [1], [0, 0, 1, 1], [], []>} : vector<8x8xbf16>, vector<8x32xbf16>, vector<8x32xf32> -> vector<8x32xf32>
    %155 = arith.addf %129, %154 : vector<8x32xf32>
    %c0_55 = arith.constant 0 : index
    %c0_56 = arith.constant 0 : index
    %c0_57 = arith.constant 0 : index
    %156 = vector.load %arg8[%c0_55, %c0_56, %c0_57] : memref<1x8x32xf32, #tpu.memory_space<vmem>>, vector<1x8x32xf32>
    %157 = vector.shape_cast %156 : vector<1x8x32xf32> to vector<8x32xf32>
    %158 = vector.shape_cast %155 : vector<8x32xf32> to vector<1x8x32xf32>
    tpu.vector_store %arg8[%c0_55, %c0_56, %c0_57], %158 {strides = array<i32>} : memref<1x8x32xf32, #tpu.memory_space<vmem>>, vector<1x8x32xf32>,
    return
  }
  func.func @transform_0(%arg0: i32) -> (i32, i32, i32) {
    %c0_i32 = arith.constant 0 : i32
    %c0_i32_0 = arith.constant 0 : i32
    %c0_i32_1 = arith.constant 0 : i32
    return %arg0, %c0_i32, %c0_i32_0 : i32, i32, i32
  }
  func.func @transform_1(%arg0: i32) -> (i32, i32, i32) {
    %c0_i32 = arith.constant 0 : i32
    %c0_i32_0 = arith.constant 0 : i32
    %c0_i32_1 = arith.constant 0 : i32
    return %arg0, %c0_i32, %c0_i32_0 : i32, i32, i32
  }
  func.func @transform_2(%arg0: i32) -> (i32, i32) {
    %c0_i32 = arith.constant 0 : i32
    %c0_i32_0 = arith.constant 0 : i32
    %c0_i32_1 = arith.constant 0 : i32
    return %c0_i32, %c0_i32_0 : i32, i32
  }
  func.func @transform_3(%arg0: i32) -> (i32, i32) {
    %c0_i32 = arith.constant 0 : i32
    %c0_i32_0 = arith.constant 0 : i32
    %c0_i32_1 = arith.constant 0 : i32
    return %c0_i32, %c0_i32_0 : i32, i32
  }
  func.func @transform_4(%arg0: i32) -> (i32, i32) {
    %c0_i32 = arith.constant 0 : i32
    %c0_i32_0 = arith.constant 0 : i32
    %c0_i32_1 = arith.constant 0 : i32
    return %c0_i32, %c0_i32_0 : i32, i32
  }
  func.func @transform_5(%arg0: i32) -> (i32, i32) {
    %c0_i32 = arith.constant 0 : i32
    %c0_i32_0 = arith.constant 0 : i32
    %c0_i32_1 = arith.constant 0 : i32
    return %c0_i32, %c0_i32_0 : i32, i32
  }
  func.func @transform_6(%arg0: i32) -> (i32, i32, i32) {
    %c0_i32 = arith.constant 0 : i32
    %c0_i32_0 = arith.constant 0 : i32
    %c0_i32_1 = arith.constant 0 : i32
    %c0_i32_2 = arith.constant 0 : i32
    return %c0_i32, %c0_i32_0, %c0_i32_1 : i32, i32, i32
  }
  func.func @transform_7(%arg0: i32) -> (i32, i32, i32) {
    %c0_i32 = arith.constant 0 : i32
    %c0_i32_0 = arith.constant 0 : i32
    %c0_i32_1 = arith.constant 0 : i32
    return %arg0, %c0_i32, %c0_i32_0 : i32, i32, i32
  }
}

</mosaic_0001>

<bundles_post_ra>
// kernel: fwd.17
= control target key start
LH: loop header
LB: loop body
LE: loop exit
PB: predicated region body
PF: predicated region fallthrough
CT: control target
= control target key end

     0   :  { %vm25_vm0 = vcmask 261120   ;;  %v362_v4 = vmov 32.0   ;;  %s476_s0 = inlined_call_operand.vmem [shape: f32[16,32], index: 0, kind: input, shape index: {}]   ;;  %s477_s1 = inlined_call_operand.vmem [shape: f32[1,32], index: 1, kind: input, shape index: {}]   ;;  %s478_s2 = inlined_call_operand.vmem [shape: f32[1,32], index: 2, kind: input, shape index: {}]   ;;  %s479_s3 = inlined_call_operand.vmem [shape: bf16[32,128], index: 3, kind: input, shape index: {}]   ;;  %s480_s4 = inlined_call_operand.vmem [shape: bf16[128,32], index: 4, kind: input, shape index: {}]   ;;  %s481_s5 = inlined_call_operand.vmem [shape: f32[16,32], index: 5, kind: output, shape index: {}]  }
   0x1   :  { %v396_v0 = vld [vmem:[%s476_s0] sm:$0xff]  ;;  %v403_v2 = vld [vmem:[%s476_s0 + $0x8] sm:$0xff]  ;;  %352 = vrcp.f32 %v362_v4  ;;  %v348_v52 = vld [vmem:[%s480_s4 + $0x38] sm:$0xff] }
   0x2   :  { %v26_v1 = vsel %vm25_vm0, %v396_v0, 0.0  ;;  %v29_v3 = vsel %vm25_vm0, %v403_v2, 0.0  ;;  %v340_v21 = vld [vmem:[%s479_s3 + $0x8] sm:$0xff]  ;;  %v339_v23 = vld [vmem:[%s479_s3] sm:$0xff]  ;;  %274 = vmatpush.bf16.msra.mxu1 %v348_v52  ;;  %v347_v56 = vld [vmem:[%s480_s4 + $0x30] sm:$0xff] }
   0x3   :  { %27 = vadd.xlane.f32.xlu0 %v26_v1  ;;  %113 = vmatpush.bf16.msra.mxu0 %v340_v21  ;;  %v350_v42 = vld [vmem:[%s477_s1] ss:$0 sm:$0xff]  ;;  %v346_v60 = vld [vmem:[%s480_s4 + $0x28] sm:$0xff] }
   0x4   :  { %v351_v47 = vld [vmem:[%s478_s2] ss:$0 sm:$0xff] }
   0x5   :  { %v345_v4 = vld [vmem:[%s480_s4 + $0x20] sm:$0xff] }
   0x6   :  { %275 = vmatpush.bf16.msra.mxu1 %v347_v56 }
   0x7   :  { %v353_v5 = vpop.eup %352  ;;  %114 = vmatpush.bf16.msra.mxu0 %v339_v23 }
   0x8   :  { %v33_v6 = vmul.f32 32.0, %v353_v5  ;;  %vm37_vm1 = vweird.f32 %v353_v5 }
   0xa   :  { %v34_v7 = vsub.f32 1.0, %v33_v6  ;;  %276 = vmatpush.bf16.msra.mxu1 %v346_v60 }
   0xb   :  { %30 = vadd.xlane.f32.xlu0 %v29_v3 }
   0xc   :  { %v35_v8 = vmul.f32 %v353_v5, %v34_v7 }
   0xe   :  { %v36_v9 = vadd.f32 %v353_v5, %v35_v8  ;;  %277 = vmatpush.bf16.msra.mxu1 %v345_v4 }
  0x10   :  { %v38_v10 = vsel %vm37_vm1, %v353_v5, %v36_v9 }
  0x76   :  { %v28_v11 = vpop.xlane.xlu0 %27 }
  0x77   :  { %v39_v12 = vmul.f32 %v38_v10, %v28_v11 }
  0x79   :  { %v41_v13 = vsub.f32 %v396_v0, %v39_v12 }
  0x7b   :  { %v43_v14 = vmul.f32 %v41_v13, %v41_v13 }
  0x7d   :  { %v45_v15 = vsel %vm25_vm0, %v43_v14, 0.0 }
  0x7e   :  { %46 = vadd.xlane.f32.xlu1 %v45_v15  ;;  %v31_v16 = vpop.xlane.xlu0 %30 }
  0x7f   :  { %v40_v17 = vmul.f32 %v38_v10, %v31_v16 }
  0x81   :  { %v42_v18 = vsub.f32 %v403_v2, %v40_v17 }
  0x83   :  { %v44_v19 = vmul.f32 %v42_v18, %v42_v18 }
  0x85   :  { %v48_v20 = vsel %vm25_vm0, %v44_v19, 0.0 }
  0x86   :  { %49 = vadd.xlane.f32.xlu1 %v48_v20 }
  0xf1   :  { %v47_v22 = vpop.xlane.xlu1 %46 }
  0xf2   :  { %v51_v24 = vmul.f32 %v47_v22, %v38_v10 }
  0xf4   :  { %v53_v25 = vadd.f32 1e-05, %v51_v24 }
  0xf6   :  { %354 = vrsqrt.f32 %v53_v25  ;;  %vm61_vm3 = vweird.f32 %v53_v25 }
  0xf9   :  { %v50_v26 = vpop.xlane.xlu1 %49 }
  0xfa   :  { %v52_v27 = vmul.f32 %v50_v26, %v38_v10  ;;  %v344_v10 = vld [vmem:[%s480_s4 + $0x18] sm:$0xff]  ;;  %v342_v26 = vld [vmem:[%s480_s4 + $0x8] sm:$0xff] }
  0xfb   :  { %278 = vmatpush.bf16.msra.mxu1 %v344_v10 }
  0xfc   :  { %v355_v28 = vpop.eup %354  ;;  %v54_v29 = vadd.f32 1e-05, %v52_v27 }
  0xfd   :  { %v56_v30 = vmul.f32 %v355_v28, %v53_v25  ;;  %vm62_vm2 = vweird.f32 %v355_v28 }
  0xfe   :  { %356 = vrsqrt.f32 %v54_v29  ;;  %vm63_vm4 = vmor %vm61_vm3, %vm62_vm2  ;;  %vm71_vm6 = vweird.f32 %v54_v29 }
  0xff   :  { %v57_v31 = vmul.f32 %v355_v28, %v56_v30 }
 0x101   :  { %v58_v32 = vmul.f32 0.5, %v57_v31 }
 0x103   :  { %v59_v33 = vsub.f32 1.5, %v58_v32  ;;  %v341_v32 = vld [vmem:[%s480_s4] sm:$0xff] }
 0x104   :  { %v357_v34 = vpop.eup %356 }
 0x105   :  { %v60_v35 = vmul.f32 %v355_v28, %v59_v33  ;;  %v66_v36 = vmul.f32 %v357_v34, %v54_v29  ;;  %vm72_vm5 = vweird.f32 %v357_v34 }
 0x106   :  { %vm73_vm7 = vmor %vm71_vm6, %vm72_vm5 }
 0x107   :  { %v67_v37 = vmul.f32 %v357_v34, %v66_v36  ;;  %v64_v38 = vsel %vm63_vm4, %v355_v28, %v60_v35 }
 0x108   :  { %v75_v41 = vmul.f32 %v64_v38, %v41_v13 }
 0x109   :  { %v68_v39 = vmul.f32 0.5, %v67_v37 }
 0x10a   :  { %v80_v46 = vmul.f32 %v350_v42, %v75_v41 }
 0x10b   :  { %v69_v40 = vsub.f32 1.5, %v68_v39 }
 0x10c   :  { %v85_v49 = vadd.f32 %v351_v47, %v80_v46 }
 0x10d   :  { %v70_v43 = vmul.f32 %v357_v34, %v69_v40 }
 0x10f   :  { %v74_v44 = vsel %vm73_vm7, %v357_v34, %v70_v43 }
 0x110   :  { %v76_v45 = vmul.f32 %v74_v44, %v42_v18  ;;  %v343_v18 = vld [vmem:[%s480_s4 + $0x10] sm:$0xff] }
 0x111   :  { %279 = vmatpush.bf16.msra.mxu1 %v343_v18 }
 0x112   :  { %v81_v48 = vmul.f32 %v350_v42, %v76_v45 }
 0x114   :  { %v86_v50 = vadd.f32 %v351_v47, %v81_v48 }
 0x115   :  { %280 = vmatpush.bf16.msra.mxu1 %v342_v26 }
 0x116   :  { %v87_v51 = vpack.c.bf16 %v86_v50, %v85_v49 }
 0x118   :  { %304 = vmatmul.msk.bf16.vlgmr.msra.gmra.mxu0 %vm25_vm0, %v87_v51 }
 0x119   :  { %281 = vmatpush.bf16.msra.mxu1 %v341_v32 }
 0x195   :  { %v427_v53 = vpop.f32.mrf.mxu0 }
 0x196   :  { %v430_v54 = vmul.f32 0.70710677, %v427_v53 }
 0x198   :  { %v125_v55 = vmul.f32 %v430_v54, %v430_v54 }
 0x19a   :  { %v126_v57 = vmin.f32 %v125_v55, 16.0 }
 0x19c   :  { %v127_v58 = vmul.f32 2.1237322e-06, %v126_v57  ;;  %v138_v59 = vmul.f32 3.8918573e-05, %v126_v57 }
 0x19d   :  { %v440_v61 = vpop.f32.mrf.mxu0 }
 0x19e   :  { %v128_v62 = vadd.f32 0.00028619796, %v127_v58  ;;  %v139_v63 = vadd.f32 0.001143296, %v138_v59  ;;  %v443_v1 = vmul.f32 0.70710677, %v440_v61 }
 0x1a0   :  { %v140_v3 = vmul.f32 %v139_v63, %v126_v57  ;;  %v165_v5 = vmul.f32 %v443_v1, %v443_v1  ;;  %v129_v6 = vmul.f32 %v128_v62, %v126_v57 }
 0x1a2   :  { %v141_v7 = vadd.f32 0.014752088, %v140_v3  ;;  %v166_v8 = vmin.f32 %v165_v5, 16.0  ;;  %v130_v13 = vadd.f32 0.0036580483, %v129_v6 }
 0x1a4   :  { %v142_v9 = vmul.f32 %v141_v7, %v126_v57  ;;  %v167_v11 = vmul.f32 2.1237322e-06, %v166_v8  ;;  %v178_v12 = vmul.f32 3.8918573e-05, %v166_v8  ;;  %v131_v21 = vmul.f32 %v130_v13, %v126_v57 }
 0x1a6   :  { %v143_v14 = vadd.f32 0.112945676, %v142_v9  ;;  %v168_v15 = vadd.f32 0.00028619796, %v167_v11  ;;  %v179_v16 = vadd.f32 0.001143296, %v178_v12 }
 0x1a7   :  { %v132_v28 = vadd.f32 0.05243302, %v131_v21 }
 0x1a8   :  { %v144_v17 = vmul.f32 %v143_v14, %v126_v57  ;;  %v169_v19 = vmul.f32 %v168_v15, %v166_v8  ;;  %v180_v20 = vmul.f32 %v179_v16, %v166_v8  ;;  %v121_v14 = vmul.f32 0.5, %v427_v53 }
 0x1a9   :  { %v133_v34 = vmul.f32 %v132_v28, %v126_v57  ;;  %v122_v15 = vmul.f32 0.5, %v440_v61 }
 0x1aa   :  { %v145_v22 = vadd.f32 0.4994258, %v144_v17  ;;  %v170_v23 = vadd.f32 0.0036580483, %v169_v19  ;;  %v181_v24 = vadd.f32 0.014752088, %v180_v20 }
 0x1ab   :  { %v134_v39 = vadd.f32 0.18741608, %v133_v34 }
 0x1ac   :  { %v146_v25 = vmul.f32 %v145_v22, %v126_v57  ;;  %v182_v27 = vmul.f32 %v181_v24, %v166_v8  ;;  %v171_v30 = vmul.f32 %v170_v23, %v166_v8 }
 0x1ad   :  { %v135_v44 = vmul.f32 %v134_v39, %v126_v57 }
 0x1ae   :  { %v147_v29 = vadd.f32 1.0, %v146_v25  ;;  %v183_v31 = vadd.f32 0.112945676, %v182_v27  ;;  %v172_v35 = vadd.f32 0.05243302, %v171_v30 }
 0x1af   :  { %v136_v50 = vadd.f32 1.1283791, %v135_v44 }
 0x1b0   :  { %358 = vrcp.f32 %v147_v29  ;;  %v184_v33 = vmul.f32 %v183_v31, %v166_v8  ;;  %v173_v41 = vmul.f32 %v172_v35, %v166_v8  ;;  %v159_v46 = vand.u32 2147483648, %v147_v29 }
 0x1b1   :  { %v157_v48 = vand.u32 2147483647, %v147_v29  ;;  %vm153_vm9 = vweird.f32 %v147_v29  ;;  %v137_v60 = vmul.f32 %v136_v50, %v430_v54 }
 0x1b2   :  { %v185_v36 = vadd.f32 0.4994258, %v184_v33  ;;  %v174_v47 = vadd.f32 0.18741608, %v173_v41  ;;  %v160_v55 = vor.u32 1.1754944e-38, %v159_v46 }
 0x1b3   :  { %vm158_vm11 = vcmp.eq.f32.partialorder %v157_v48, 8.507059e+37 }
 0x1b4   :  { %v186_v37 = vmul.f32 %v185_v36, %v166_v8  ;;  %v175_v56 = vmul.f32 %v174_v47, %v166_v8 }
 0x1b6   :  { %v359_v38 = vpop.eup %358  ;;  %v187_v42 = vadd.f32 1.0, %v186_v37  ;;  %v176_v57 = vadd.f32 1.1283791, %v175_v56 }
 0x1b7   :  { %v149_v40 = vmul.f32 %v359_v38, %v147_v29  ;;  %vm154_vm8 = vweird.f32 %v359_v38 }
 0x1b8   :  { %360 = vrcp.f32 %v187_v42  ;;  %vm155_vm10 = vmor %vm153_vm9, %vm154_vm8  ;;  %v199_v63 = vand.u32 2147483648, %v187_v42  ;;  %v197_v5 = vand.u32 2147483647, %v187_v42  ;;  %vm193_vm13 = vweird.f32 %v187_v42 }
 0x1b9   :  { %v150_v43 = vsub.f32 1.0, %v149_v40  ;;  %v177_v9 = vmul.f32 %v176_v57, %v443_v1 }
 0x1ba   :  { %v200_v7 = vor.u32 1.1754944e-38, %v199_v63  ;;  %vm198_vm15 = vcmp.eq.f32.partialorder %v197_v5, 8.507059e+37 }
 0x1bb   :  { %v151_v45 = vmul.f32 %v359_v38, %v150_v43 }
 0x1bd   :  { %v152_v49 = vadd.f32 %v359_v38, %v151_v45 }
 0x1be   :  { %v361_v51 = vpop.eup %360 }
 0x1bf   :  { %v156_v52 = vsel %vm155_vm10, %v359_v38, %v152_v49  ;;  %v189_v58 = vmul.f32 %v361_v51, %v187_v42  ;;  %vm194_vm12 = vweird.f32 %v361_v51 }
 0x1c0   :  { %v161_v59 = vsel %vm158_vm11, %v160_v55, %v156_v52  ;;  %vm195_vm14 = vmor %vm193_vm13, %vm194_vm12 }
 0x1c1   :  { %v190_v62 = vsub.f32 1.0, %v189_v58  ;;  %v162_v3 = vmul.f32 %v161_v59, %v137_v60 }
 0x1c3   :  { %v191_v4 = vmul.f32 %v361_v51, %v190_v62  ;;  %v305_v8 = vclamps-f32 %v162_v3, 1.0 }
 0x1c5   :  { %v192_v6 = vadd.f32 %v361_v51, %v191_v4  ;;  %v205_v54 = vadd.f32 1.0, %v305_v8 }
 0x1c7   :  { %v196_v10 = vsel %vm195_vm14, %v361_v51, %v192_v6  ;;  %v207_v18 = vmul.f32 %v205_v54, %v121_v14 }
 0x1c8   :  { %v201_v11 = vsel %vm198_vm15, %v200_v7, %v196_v10 }
 0x1c9   :  { %v202_v12 = vmul.f32 %v201_v11, %v177_v9 }
 0x1cb   :  { %v306_v13 = vclamps-f32 %v202_v12, 1.0 }
 0x1cd   :  { %v206_v16 = vadd.f32 1.0, %v306_v13 }
 0x1cf   :  { %v208_v17 = vmul.f32 %v206_v16, %v122_v15 }
 0x1d1   :  { %v209_v19 = vpack.c.bf16 %v208_v17, %v207_v18 }
 0x1d3   :  { %282 = vmatmul.bf16.vlgmr.msra.gmra.mxu1 %v209_v19 }
 0x250   :  { %v283_v20 = vpop.f32.mrf.mxu1 }
 0x251   :  { %v288_v21 = vadd.f32 %v283_v20, %v396_v0 }
 0x253   :  { %290 = vst.msk [vmem:[%s481_s5] sm:$0xff] %vm25_vm0, %v288_v21 }
 0x258   :  { %v285_v1 = vpop.f32.mrf.mxu1 }
 0x259   :  { %v289_v22 = vadd.f32 %v285_v1, %v403_v2 }
 0x25b   :  { %291 = vst.msk [vmem:[%s481_s5 + $0x8] sm:$0xff] %vm25_vm0, %v289_v22 }

// kernel: fwd.21
= control target key start
LH: loop header
LB: loop body
LE: loop exit
PB: predicated region body
PF: predicated region fallthrough
CT: control target
= control target key end

     0   :  { %vm24_vm0 = vcmask 261120   ;;  %v153_v4 = vmov 32.0   ;;  %vm122_vm8 = vcmask 785408   ;;  %s221_s0 = inlined_call_operand.vmem [shape: f32[16,32], index: 0, kind: input, shape index: {}]   ;;  %s222_s1 = inlined_call_operand.vmem [shape: f32[1,32], index: 1, kind: input, shape index: {}]   ;;  %s223_s2 = inlined_call_operand.vmem [shape: f32[1,32], index: 2, kind: input, shape index: {}]   ;;  %s224_s3 = inlined_call_operand.vmem [shape: bf16[32,96], index: 3, kind: input, shape index: {}]   ;;  %s225_s4 = inlined_call_operand.vmem [shape: f32[16,32], index: 4, kind: output, shape index: {0}]   ;;  %s226_s5 = inlined_call_operand.vmem [shape: f32[16,96], index: 5, kind: output, shape index: {1}]  }
   0x1   :  { %v20_v0 = vld [vmem:[%s221_s0] sm:$0xff]  ;;  %v21_v2 = vld [vmem:[%s221_s0 + $0x8] sm:$0xff]  ;;  %147 = vrcp.f32 %v153_v4 }
   0x2   :  { %v25_v1 = vsel %vm24_vm0, %v20_v0, 0.0  ;;  %v28_v3 = vsel %vm24_vm0, %v21_v2, 0.0  ;;  %v143_v21 = vld [vmem:[%s224_s3 + $0x8] sm:$0xff]  ;;  %v142_v23 = vld [vmem:[%s224_s3] sm:$0xff] }
   0x3   :  { %26 = vadd.xlane.f32.xlu0 %v25_v1  ;;  %114 = vmatpush.bf16.msra.mxu0 %v143_v21  ;;  %v145_v37 = vld [vmem:[%s222_s1] ss:$0 sm:$0xff] }
   0x4   :  { %v146_v41 = vld [vmem:[%s223_s2] ss:$0 sm:$0xff] }
   0x7   :  { %v148_v5 = vpop.eup %147  ;;  %115 = vmatpush.bf16.msra.mxu0 %v142_v23 }
   0x8   :  { %v32_v6 = vmul.f32 32.0, %v148_v5  ;;  %vm36_vm1 = vweird.f32 %v148_v5 }
   0xa   :  { %v33_v7 = vsub.f32 1.0, %v32_v6 }
   0xb   :  { %29 = vadd.xlane.f32.xlu0 %v28_v3 }
   0xc   :  { %v34_v8 = vmul.f32 %v148_v5, %v33_v7 }
   0xe   :  { %v35_v9 = vadd.f32 %v148_v5, %v34_v8 }
  0x10   :  { %v37_v10 = vsel %vm36_vm1, %v148_v5, %v35_v9 }
  0x76   :  { %v27_v11 = vpop.xlane.xlu0 %26 }
  0x77   :  { %v38_v12 = vmul.f32 %v37_v10, %v27_v11 }
  0x79   :  { %v40_v13 = vsub.f32 %v20_v0, %v38_v12 }
  0x7b   :  { %v42_v14 = vmul.f32 %v40_v13, %v40_v13 }
  0x7d   :  { %v44_v15 = vsel %vm24_vm0, %v42_v14, 0.0 }
  0x7e   :  { %45 = vadd.xlane.f32.xlu1 %v44_v15  ;;  %v30_v16 = vpop.xlane.xlu0 %29 }
  0x7f   :  { %v39_v17 = vmul.f32 %v37_v10, %v30_v16 }
  0x81   :  { %v41_v18 = vsub.f32 %v21_v2, %v39_v17 }
  0x83   :  { %v43_v19 = vmul.f32 %v41_v18, %v41_v18 }
  0x85   :  { %v47_v20 = vsel %vm24_vm0, %v43_v19, 0.0 }
  0x86   :  { %48 = vadd.xlane.f32.xlu1 %v47_v20 }
  0xf1   :  { %v46_v22 = vpop.xlane.xlu1 %45 }
  0xf2   :  { %v50_v24 = vmul.f32 %v46_v22, %v37_v10 }
  0xf4   :  { %v52_v25 = vadd.f32 1e-05, %v50_v24 }
  0xf6   :  { %149 = vrsqrt.f32 %v52_v25  ;;  %vm60_vm3 = vweird.f32 %v52_v25 }
  0xf9   :  { %v49_v26 = vpop.xlane.xlu1 %48 }
  0xfa   :  { %v51_v27 = vmul.f32 %v49_v26, %v37_v10 }
  0xfc   :  { %v150_v28 = vpop.eup %149  ;;  %v53_v29 = vadd.f32 1e-05, %v51_v27 }
  0xfd   :  { %v55_v30 = vmul.f32 %v150_v28, %v52_v25  ;;  %vm61_vm2 = vweird.f32 %v150_v28 }
  0xfe   :  { %151 = vrsqrt.f32 %v53_v29  ;;  %vm62_vm4 = vmor %vm60_vm3, %vm61_vm2  ;;  %vm70_vm6 = vweird.f32 %v53_v29 }
  0xff   :  { %v56_v31 = vmul.f32 %v150_v28, %v55_v30 }
 0x101   :  { %v57_v32 = vmul.f32 0.5, %v56_v31 }
 0x103   :  { %v58_v33 = vsub.f32 1.5, %v57_v32 }
 0x104   :  { %v152_v34 = vpop.eup %151 }
 0x105   :  { %v59_v35 = vmul.f32 %v150_v28, %v58_v33  ;;  %v65_v36 = vmul.f32 %v152_v34, %v53_v29  ;;  %vm71_vm5 = vweird.f32 %v152_v34 }
 0x106   :  { %vm72_vm7 = vmor %vm70_vm6, %vm71_vm5 }
 0x107   :  { %v63_v38 = vsel %vm62_vm4, %v150_v28, %v59_v35  ;;  %v66_v39 = vmul.f32 %v152_v34, %v65_v36 }
 0x108   :  { %v74_v40 = vmul.f32 %v63_v38, %v40_v13 }
 0x109   :  { %v67_v42 = vmul.f32 0.5, %v66_v39 }
 0x10a   :  { %v79_v43 = vmul.f32 %v145_v37, %v74_v40 }
 0x10b   :  { %v68_v44 = vsub.f32 1.5, %v67_v42 }
 0x10c   :  { %v84_v45 = vadd.f32 %v146_v41, %v79_v43 }
 0x10d   :  { %v69_v46 = vmul.f32 %v152_v34, %v68_v44 }
 0x10e   :  { %86 = vst.msk [vmem:[%s225_s4] sm:$0xff] %vm24_vm0, %v84_v45 }
 0x10f   :  { %v73_v47 = vsel %vm72_vm7, %v152_v34, %v69_v46 }
 0x110   :  { %v75_v48 = vmul.f32 %v73_v47, %v41_v18 }
 0x112   :  { %v80_v49 = vmul.f32 %v145_v37, %v75_v48 }
 0x114   :  { %v85_v50 = vadd.f32 %v146_v41, %v80_v49 }
 0x116   :  { %87 = vst.msk [vmem:[%s225_s4 + $0x8] sm:$0xff] %vm24_vm0, %v85_v50  ;;  %v88_v51 = vpack.c.bf16 %v85_v50, %v84_v45 }
 0x118   :  { %141 = vmatmul.msk.bf16.vlgmr.msra.gmra.mxu0 %vm24_vm0, %v88_v51 }
 0x195   :  { %v117_v52 = vpop.f32.mrf.mxu0 }
 0x196   :  { %123 = vst.msk [vmem:[%s226_s5] sm:$0xff] %vm122_vm8, %v117_v52 }
 0x19d   :  { %v119_v53 = vpop.f32.mrf.mxu0 }
 0x19e   :  { %124 = vst.msk [vmem:[%s226_s5 + $0x8] sm:$0xff] %vm122_vm8, %v119_v53 }

// kernel: fwd.16
= control target key start
LH: loop header
LB: loop body
LE: loop exit
PB: predicated region body
PF: predicated region fallthrough
CT: control target
= control target key end

     0   :  { %s673_s12 = smov 0   ;;  %s756_s0 = inlined_call_operand.vmem [shape: f32[2,8,96], index: 0, kind: input, shape index: {}]   ;;  %s757_s1 = inlined_call_operand.vmem [shape: bf16[4,8,32], index: 1, kind: input, shape index: {}]   ;;  %s758_s2 = inlined_call_operand.vmem [shape: f32[2,8,32], index: 2, kind: input, shape index: {}]   ;;  %s759_s3 = inlined_call_operand.vmem [shape: f32[2,8,32], index: 3, kind: output, shape index: {}]  }
   0x1 LB: > { %s574_s13 = sadd.s32 4294967295, %s640_s12   ;;  %p578_p0 = scmp.ge.s32.totalorder %s640_s12, 1  ;;  %s640_s12 = sphi %s673_s12, %s13_s12  }
   0x2   : > { %p145_p1 = scmp.lt.s32.totalorder %s640_s12, 3 }
   0x4   : > { %p146_p2 = pnand %p578_p0, %p145_p1 }
   0x5   : > { %p171_p3 = scmp.lt.s32.totalorder (!%p146_p2), %s574_s13, 1  ;;  %s642_s18 = smov (!%p146_p2), 96  }
   0x6   : > { %149 = sbr.rel (%p146_p2) target bundleno = 1359 (0x54f), region = 32  ;;  %s643_s19 = smov (!%p146_p2), 120  }
   0x7   : > { %s644_s20 = smov (!%p146_p2), 88   ;;  %s645_s21 = smov (!%p146_p2), 64  }
   0x8   : > { %s646_s22 = smov (!%p146_p2), 56   ;;  %s647_s23 = smov (!%p146_p2), 80  }
   0x9   : > { %s648_s24 = smov (!%p146_p2), 104   ;;  %s649_s25 = smov (!%p146_p2), 112  }
   0xa   : > { %s650_s26 = smov (!%p146_p2), 72   ;;  %s651_s7 = smov (!%p146_p2), 40  }
   0xb   : > { %s761_s13 = smov (!%p171_p3, %s574_s13), 1  ;;  %vm190_vm0 = vcmask 64512   ;;  %vm228_vm1 = vcmask 1043456   ;;  %v246_v45 = vld [vmem:[%s757_s1] sm:$0xf]  ;;  %s652_s8 = smov 48  }
   0xc   : > { %s681_s14 = sshll.u32 %s761_s13, 3  ;;  %v251_v46 = vsel %vm228_vm1, %v246_v45, 0  ;;  %v587_v47 = vld [vmem:[%s757_s1 + $0x4] sm:$0xf]  ;;  %vm507_vm2 = vcmask 261120  }
   0xd   : > { %s174_s17 = scalar_lea.vmem %s756_s0, %s681_s14  ;;  %260 = vmatpush.bf16.msra.mxu2 %v251_v46  ;;  %v331_v48 = vsel %vm228_vm1, %v587_v47, 0  ;;  %s178_s6 = scalar_lea.vmem %s758_s2, %s681_s14 }
   0xe   : > { %v184_v0 = vld [vmem:[%s174_s17] sm:$0xff]  ;;  %s182_s17 = scalar_lea.vmem %s759_s3, %s681_s14 }
   0xf   : > { %v687_v1 = vpack.c.bf16 %v184_v0, %v184_v0  ;;  %v185_v0 = vld [vmem:[%s178_s6] sm:$0xff] }
  0x11   : > { %188 = vrot.lane.b32.xlu0 %v687_v1, %s642_s18  ;;  %267 = vrot.lane.b32.xlu1 %v687_v1, %s643_s19 }
  0x12   : > { %340 = vmatpush.bf16.msrb.mxu2 %v331_v48 }
  0x19   : > { %269 = vrot.lane.b32.xlu0 %v687_v1, %s644_s20 }
  0x21   : > { %223 = vrot.lane.b32.xlu0 %v687_v1, %s645_s21 }
  0x29   : > { %303 = vrot.lane.b32.xlu0 %v687_v1, %s646_s22 }
  0x31   : > { %349 = vrot.lane.b32.xlu0 %v687_v1, %s647_s23 }
  0x39   : > { %427 = vrot.lane.b32.xlu0 %v687_v1, %s648_s24 }
  0x41   : > { %347 = vrot.lane.b32.xlu0 %v687_v1, %s649_s25 }
  0x83   : > { %v189_v2 = vpop.permute.xlu0 %188  ;;  %v268_v6 = vpop.permute.xlu1 %267 }
  0x84   : > { %v195_v3 = vsel %vm190_vm0, %v189_v2, 0 }
  0x85   : > { %204 = vmatpush.bf16.xpose.msra.mxu0 %v195_v3 }
  0x8b   : > { %v270_v4 = vpop.permute.xlu0 %269 }
  0x8c   : > { %582 = vmatmul.msk.bf16.vlgmr.msra.gmra.mxu0 %vm190_vm0, %v687_v1  ;;  %v275_v5 = vsel %vm190_vm0, %v270_v4, 0 }
  0x8d   : > { %284 = vmatpush.bf16.xpose.msra.mxu3 %v275_v5 }
  0x93   : > { %v224_v15 = vpop.permute.xlu0 %223 }
  0x94   : > { %585 = vmatmul.msk.bf16.vlgmr.msra.gmra.mxu3 %vm190_vm0, %v268_v6  ;;  %v230_v31 = vsel %vm228_vm1, %v224_v15, 0 }
  0x95   : > { %239 = vmatpush.bf16.msra.mxu1 %v230_v31 }
  0x9b   : > { %v304_v19 = vpop.permute.xlu0 %303 }
  0x9c   : > { %v309_v32 = vsel %vm228_vm1, %v304_v19, 0 }
  0x9d   : > { %318 = vmatpush.bf16.msrb.mxu1 %v309_v32 }
  0xa3   : > { %v350_v21 = vpop.permute.xlu0 %349 }
  0xa4   : > { %v355_v23 = vsel %vm190_vm0, %v350_v21, 0 }
  0xa5   : > { %364 = vmatpush.bf16.xpose.msrb.mxu0 %v355_v23 }
  0xab   : > { %v428_v27 = vpop.permute.xlu0 %427 }
  0xb3   : > { %v348_v30 = vpop.permute.xlu0 %347 }
  0xb4   : > { %589 = vmatmul.msk.bf16.vlgmr.msrb.gmra.mxu0 %vm190_vm0, %v348_v30 }
 0x109   : > { %v206_v7 = vpop.f32.mrf.mxu0 }
 0x10a   : > { %v210_v8 = vmul.f32 0.35355338, %v206_v7 }
 0x10c   : > { %v211_v9 = vsel %vm190_vm0, %v210_v8, -inf }
 0x10d   : > { %212 = vmax.xlane.f32.xlu1 %v211_v9 }
 0x111   : > { %v208_v10 = vpop.f32.mrf.mxu0 }
 0x117   : > { %v286_v11 = vpop.f32.mrf.mxu3 }
 0x118   : > { %v290_v12 = vmul.f32 0.35355338, %v286_v11 }
 0x11a   : > { %v291_v13 = vsel %vm190_vm0, %v290_v12, -inf }
 0x11b   : > { %292 = vmax.xlane.f32.xlu2 %v291_v13 }
 0x11f   : > { %v288_v14 = vpop.f32.mrf.mxu3 }
 0x131   : > { %v366_v40 = vpop.f32.mrf.mxu0 }
 0x132   : > { %v370_v42 = vmul.f32 0.35355338, %v366_v40 }
 0x134   : > { %v371_v43 = vsel %vm190_vm0, %v370_v42, -inf }
 0x139   : > { %v368_v44 = vpop.f32.mrf.mxu0 }
 0x180   : > { %v213_v16 = vpop.xlane.xlu1 %212 }
 0x181   : > { %v214_v17 = vsub.f32 %v210_v8, %v213_v16 }
 0x183   : > { %v215_v18 = vmul.f32 1.442695, %v214_v17 }
 0x185   : > { %618 = vpow2.f32 %v215_v18 }
 0x18b   : > { %v619_v20 = vpop.eup %618 }
 0x18c   : > { %v217_v22 = vsel %vm190_vm0, %v619_v20, 0.0 }
 0x18d   : > { %218 = vadd.xlane.f32.xlu2 %v217_v22 }
 0x18e   : > { %v293_v24 = vpop.xlane.xlu2 %292 }
 0x18f   : > { %v294_v25 = vsub.f32 %v290_v12, %v293_v24 }
 0x191   : > { %v295_v26 = vmul.f32 1.442695, %v294_v25 }
 0x193   : > { %620 = vpow2.f32 %v295_v26  ;;  %v595_v26 = vld [vmem:[%s757_s1 + $0xc] sm:$0xf] }
 0x199   : > { %v621_v28 = vpop.eup %620 }
 0x19a   : > { %v297_v29 = vsel %vm190_vm0, %v621_v28, 0.0 }
 0x19b   : > { %298 = vadd.xlane.f32.xlu2 %v297_v29 }
 0x1b3   : > { %429 = vrot.lane.b32.xlu2 %v687_v1, %s650_s26 }
 0x1dc   : > { %372 = vmax.xlane.f32.xlu2 %v371_v43 }
 0x1f4   : > { %463 = vrot.lane.b32.xlu2 %v687_v1, %s651_s7 }
 0x200   : > { %v219_v33 = vpop.xlane.xlu2 %218 }
 0x201   : > { %622 = vrcp.f32 %v219_v33 }
 0x207   : > { %v623_v34 = vpop.eup %622 }
 0x208   : > { %v221_v35 = vmul.f32 %v623_v34, %v619_v20 }
 0x20a   : > { %v222_v36 = vpack.c.bf16 %v221_v35, %v221_v35 }
 0x20c   : > { %583 = vmatmul.msk.bf16.vlgmr.msra.gmra.mxu1 %vm190_vm0, %v222_v36 }
 0x20e   : > { %v299_v37 = vpop.xlane.xlu2 %298 }
 0x20f   : > { %624 = vrcp.f32 %v299_v37 }
 0x215   : > { %v625_v38 = vpop.eup %624 }
 0x216   : > { %v301_v39 = vmul.f32 %v625_v38, %v621_v28  ;;  %v430_v49 = vpop.permute.xlu2 %429  ;;  %v591_v28 = vld [vmem:[%s757_s1 + $0x8] sm:$0xf] }
 0x217   : > { %v435_v52 = vsel %vm190_vm0, %v430_v49, 0  ;;  %v411_v29 = vsel %vm228_vm1, %v591_v28, 0 }
 0x218   : > { %v302_v41 = vpack.c.bf16 %v301_v39, %v301_v39  ;;  %420 = vmatpush.bf16.msra.mxu1 %v411_v29 }
 0x21c   : > { %586 = vmatmul.msk.bf16.vlgmr.msrb.gmra.mxu1 %vm190_vm0, %v302_v41 }
 0x24f   : > { %v373_v53 = vpop.xlane.xlu2 %372 }
 0x250   : > { %v374_v55 = vsub.f32 %v370_v42, %v373_v53 }
 0x252   : > { %v375_v56 = vmul.f32 1.442695, %v374_v55 }
 0x254   : > { %626 = vpow2.f32 %v375_v56 }
 0x257   : > { %v464_v15 = vpop.permute.xlu2 %463 }
 0x258   : > { %v469_v16 = vsel %vm228_vm1, %v464_v15, 0 }
 0x259   : > { %478 = vmatpush.bf16.msra.mxu0 %v469_v16 }
 0x25a   : > { %v627_v59 = vpop.eup %626 }
 0x25b   : > { %v377_v60 = vsel %vm190_vm0, %v627_v59, 0.0 }
 0x25c   : > { %378 = vadd.xlane.f32.xlu0 %v377_v60 }
 0x289   : > { %v241_v50 = vpop.f32.mrf.mxu1 }
 0x28a   : > { %v245_v51 = vpack.c.bf16 %v241_v50, %v241_v50 }
 0x28c   : > { %584 = vmatmul.msk.bf16.vlgmr.msra.gmra.mxu2 %vm190_vm0, %v245_v51 }
 0x28d   : > { %444 = vmatpush.bf16.xpose.msra.mxu2 %v435_v52 }
 0x291   : > { %v243_v54 = vpop.f32.mrf.mxu1 }
 0x299   : > { %v320_v57 = vpop.f32.mrf.mxu1 }
 0x29a   : > { %v324_v58 = vpack.c.bf16 %v320_v57, %v320_v57 }
 0x29c   : > { %588 = vmatmul.msk.bf16.vlgmr.msrb.gmra.mxu2 %vm190_vm0, %v324_v58 }
 0x2a1   : > { %v322_v61 = vpop.f32.mrf.mxu1 }
 0x2ac   : > { %593 = vmatmul.msk.bf16.vlgmr.msra.gmra.mxu2 %vm190_vm0, %v428_v27  ;;  %v491_v27 = vsel %vm228_vm1, %v595_v26, 0 }
 0x2cf   : > { %v379_v21 = vpop.xlane.xlu0 %378 }
 0x30f   : > { %v262_v62 = vpop.f32.mrf.mxu2 }
 0x310   : > { %v266_v2 = vadd.f32 %v262_v62, %v185_v0 }
 0x317   : > { %v264_v63 = vpop.f32.mrf.mxu2 }
 0x31f   : > { %v342_v3 = vpop.f32.mrf.mxu2 }
 0x320   : > { %v346_v4 = vadd.f32 %v342_v3, %v266_v2 }
 0x327   : > { %v344_v5 = vpop.f32.mrf.mxu2 }
 0x32f   : > { %v446_v6 = vpop.f32.mrf.mxu2 }
 0x330   : > { %v450_v7 = vmul.f32 0.35355338, %v446_v6 }
 0x332   : > { %v451_v8 = vsel %vm190_vm0, %v450_v7, -inf }
 0x333   : > { %452 = vmax.xlane.f32.xlu1 %v451_v8 }
 0x337   : > { %v448_v9 = vpop.f32.mrf.mxu2 }
 0x3a6   : > { %v453_v10 = vpop.xlane.xlu1 %452 }
 0x3a7   : > { %v454_v11 = vsub.f32 %v450_v7, %v453_v10 }
 0x3a9   : > { %v455_v12 = vmul.f32 1.442695, %v454_v11 }
 0x3ab   : > { %628 = vpow2.f32 %v455_v12 }
 0x3b1   : > { %v629_v13 = vpop.eup %628 }
 0x3b2   : > { %v457_v14 = vsel %vm190_vm0, %v629_v13, 0.0 }
 0x3b3   : > { %458 = vadd.xlane.f32.xlu1 %v457_v14 }
 0x3cc   : > { %383 = vrot.lane.b32.xlu1 %v687_v1, %s652_s8 }
 0x426   : > { %v459_v17 = vpop.xlane.xlu1 %458 }
 0x427   : > { %630 = vrcp.f32 %v459_v17 }
 0x428   : > { %632 = vrcp.f32 %v379_v21 }
 0x42d   : > { %v631_v18 = vpop.eup %630 }
 0x42e   : > { %v461_v19 = vmul.f32 %v631_v18, %v629_v13  ;;  %v633_v22 = vpop.eup %632 }
 0x42f   : > { %v381_v23 = vmul.f32 %v633_v22, %v627_v59 }
 0x430   : > { %v462_v20 = vpack.c.bf16 %v461_v19, %v461_v19 }
 0x431   : > { %v382_v1 = vpack.c.bf16 %v381_v23, %v381_v23 }
 0x432   : > { %594 = vmatmul.msk.bf16.vlgmr.msra.gmra.mxu0 %vm190_vm0, %v462_v20 }
 0x43e   : > { %v384_v24 = vpop.permute.xlu1 %383 }
 0x43f   : > { %v389_v25 = vsel %vm228_vm1, %v384_v24, 0 }
 0x440   : > { %398 = vmatpush.bf16.msrb.mxu3 %v389_v25 }
 0x443   : > { %590 = vmatmul.msk.bf16.vlgmr.msrb.gmra.mxu3 %vm190_vm0, %v382_v1 }
 0x444   : > { %500 = vmatpush.bf16.msra.mxu3 %v491_v27 }
 0x4af   : > { %v480_v30 = vpop.f32.mrf.mxu0 }
 0x4b0   : > { %v484_v31 = vpack.c.bf16 %v480_v30, %v480_v30 }
 0x4b2   : > { %596 = vmatmul.msk.bf16.vlgmr.msra.gmra.mxu3 %vm190_vm0, %v484_v31 }
 0x4b7   : > { %v482_v32 = vpop.f32.mrf.mxu0 }
 0x4c6   : > { %v400_v33 = vpop.f32.mrf.mxu3 }
 0x4c7   : > { %v404_v34 = vpack.c.bf16 %v400_v33, %v400_v33 }
 0x4c9   : > { %592 = vmatmul.msk.bf16.vlgmr.msra.gmra.mxu1 %vm190_vm0, %v404_v34 }
 0x4ce   : > { %v402_v35 = vpop.f32.mrf.mxu3 }
 0x535   : > { %v502_v36 = vpop.f32.mrf.mxu3 }
 0x53d   : > { %v504_v37 = vpop.f32.mrf.mxu3 }
 0x546   : > { %v422_v38 = vpop.f32.mrf.mxu1 }
 0x547   : > { %v426_v39 = vadd.f32 %v422_v38, %v346_v4 }
 0x549   : > { %v506_v40 = vadd.f32 %v502_v36, %v426_v39 }
 0x54b   : > { %508 = vst.msk [vmem:[%s182_s17] sm:$0xff] %vm507_vm2, %v506_v40 }
 0x54e   : > { %v424_v41 = vpop.f32.mrf.mxu1 }
 0x54f PF: > { %s13_s12 = sadd.s32 1, %s640_s12  }
 0x550   : > { %p10_p4 = scmp.ge.s32.totalorder %s13_s12, 4  }
 0x552   :  { %12 = sbr.rel (!%p10_p4) target bundleno = 1 (0x1), region = 68 }

// kernel: fwd.22
= control target key start
LH: loop header
LB: loop body
LE: loop exit
PB: predicated region body
PF: predicated region fallthrough
CT: control target
= control target key end

     0   :  { %s685_s12 = smov 0   ;;  %s774_s0 = inlined_call_operand.vmem [shape: f32[2,8,96], index: 0, kind: input, shape index: {}]   ;;  %s775_s1 = inlined_call_operand.vmem [shape: bf16[4,8,32], index: 1, kind: input, shape index: {}]   ;;  %s776_s2 = inlined_call_operand.vmem [shape: f32[2,8,32], index: 2, kind: input, shape index: {}]   ;;  %s777_s3 = inlined_call_operand.vmem [shape: f32[2,8,32], index: 3, kind: output, shape index: {}]  }
   0x1 LB: > { %s584_s13 = sadd.s32 4294967295, %s651_s12   ;;  %p588_p0 = scmp.ge.s32.totalorder %s651_s12, 1  ;;  %s651_s12 = sphi %s685_s12, %s13_s12  }
   0x2   : > { %p145_p1 = scmp.lt.s32.totalorder %s651_s12, 3 }
   0x4   : > { %p146_p2 = pnand %p588_p0, %p145_p1 }
   0x5   : > { %p171_p3 = scmp.lt.s32.totalorder (!%p146_p2), %s584_s13, 1  ;;  %s653_s18 = smov (!%p146_p2), 96  }
   0x6   : > { %149 = sbr.rel (%p146_p2) target bundleno = 1363 (0x553), region = 32  ;;  %s654_s19 = smov (!%p146_p2), 120  }
   0x7   : > { %s655_s20 = smov (!%p146_p2), 88   ;;  %s656_s21 = smov (!%p146_p2), 64  }
   0x8   : > { %s657_s22 = smov (!%p146_p2), 56   ;;  %s658_s23 = smov (!%p146_p2), 80  }
   0x9   : > { %s659_s24 = smov (!%p146_p2), 104   ;;  %s660_s25 = smov (!%p146_p2), 112  }
   0xa   : > { %s662_s26 = smov (!%p146_p2), 72   ;;  %s663_s7 = smov (!%p146_p2), 40  }
   0xb   : > { %s779_s13 = smov (!%p171_p3, %s584_s13), 1  ;;  %vm196_vm0 = vcmask 64512   ;;  %v186_v7 = vlaneseq  ;;  %v661_v11 = vmov -1e+30   ;;  %vm235_vm2 = vcmask 1043456   ;;  %s664_s8 = smov 48  }
   0xc   : > { %s693_s14 = sshll.u32 %s779_s13, 3  ;;  %v253_v53 = vld [vmem:[%s775_s1] sm:$0xf]  ;;  %v597_v55 = vld [vmem:[%s775_s1 + $0x4] sm:$0xf]  ;;  %vm517_vm3 = vcmask 261120  }
   0xd   : > { %s174_s17 = scalar_lea.vmem %s774_s0, %s693_s14  ;;  %v187_v8 = vshrl.u32 %v186_v7, 7  ;;  %v189_v9 = vand.u32 127, %v186_v7  ;;  %v258_v54 = vsel %vm235_vm2, %v253_v53, 0  ;;  %v339_v56 = vsel %vm235_vm2, %v597_v55, 0  ;;  %s178_s6 = scalar_lea.vmem %s776_s2, %s693_s14 }
   0xe   : > { %v184_v0 = vld [vmem:[%s174_s17] sm:$0xff]  ;;  %267 = vmatpush.bf16.msra.mxu2 %v258_v54  ;;  %s182_s17 = scalar_lea.vmem %s777_s3, %s693_s14 }
   0xf   : > { %v699_v1 = vpack.c.bf16 %v184_v0, %v184_v0  ;;  %vm190_vm1 = vcmp.ge.s32.totalorder %v187_v8, %v189_v9  ;;  %v185_v9 = vld [vmem:[%s178_s6] sm:$0xff] }
  0x10   : > { %v714_v12 = vsel %vm190_vm1, 0.0, %v661_v11 }
  0x11   : > { %194 = vrot.lane.b32.xlu0 %v699_v1, %s653_s18  ;;  %274 = vrot.lane.b32.xlu1 %v699_v1, %s654_s19 }
  0x12   : > { %348 = vmatpush.bf16.msrb.mxu2 %v339_v56 }
  0x19   : > { %276 = vrot.lane.b32.xlu0 %v699_v1, %s655_s20 }
  0x21   : > { %230 = vrot.lane.b32.xlu0 %v699_v1, %s656_s21 }
  0x29   : > { %311 = vrot.lane.b32.xlu0 %v699_v1, %s657_s22 }
  0x31   : > { %357 = vrot.lane.b32.xlu0 %v699_v1, %s658_s23 }
  0x39   : > { %436 = vrot.lane.b32.xlu0 %v699_v1, %s659_s24 }
  0x41   : > { %355 = vrot.lane.b32.xlu0 %v699_v1, %s660_s25 }
  0x83   : > { %v195_v2 = vpop.permute.xlu0 %194  ;;  %v275_v6 = vpop.permute.xlu1 %274 }
  0x84   : > { %v201_v3 = vsel %vm196_vm0, %v195_v2, 0 }
  0x85   : > { %210 = vmatpush.bf16.xpose.msra.mxu0 %v201_v3 }
  0x8b   : > { %v277_v4 = vpop.permute.xlu0 %276 }
  0x8c   : > { %592 = vmatmul.msk.bf16.vlgmr.msra.gmra.mxu0 %vm196_vm0, %v699_v1  ;;  %v282_v5 = vsel %vm196_vm0, %v277_v4, 0 }
  0x8d   : > { %291 = vmatpush.bf16.xpose.msra.mxu3 %v282_v5 }
  0x93   : > { %v231_v22 = vpop.permute.xlu0 %230 }
  0x94   : > { %595 = vmatmul.msk.bf16.vlgmr.msra.gmra.mxu3 %vm196_vm0, %v275_v6  ;;  %v237_v38 = vsel %vm235_vm2, %v231_v22, 0 }
  0x95   : > { %246 = vmatpush.bf16.msra.mxu1 %v237_v38 }
  0x9b   : > { %v312_v26 = vpop.permute.xlu0 %311 }
  0x9c   : > { %v317_v39 = vsel %vm235_vm2, %v312_v26, 0 }
  0x9d   : > { %326 = vmatpush.bf16.msrb.mxu1 %v317_v39 }
  0xa3   : > { %v358_v28 = vpop.permute.xlu0 %357 }
  0xa4   : > { %v363_v30 = vsel %vm196_vm0, %v358_v28, 0 }
  0xa5   : > { %372 = vmatpush.bf16.xpose.msrb.mxu0 %v363_v30 }
  0xab   : > { %v437_v34 = vpop.permute.xlu0 %436 }
  0xb3   : > { %v356_v37 = vpop.permute.xlu0 %355 }
  0xb4   : > { %599 = vmatmul.msk.bf16.vlgmr.msrb.gmra.mxu0 %vm196_vm0, %v356_v37  ;;  %v601_v37 = vld [vmem:[%s775_s1 + $0x8] sm:$0xf] }
  0xb5   : > { %v420_v38 = vsel %vm235_vm2, %v601_v37, 0 }
 0x109   : > { %v212_v10 = vpop.f32.mrf.mxu0 }
 0x10a   : > { %v216_v13 = vmul.f32 0.35355338, %v212_v10 }
 0x10c   : > { %v217_v14 = vadd.f32 %v216_v13, %v714_v12 }
 0x10e   : > { %v218_v15 = vsel %vm196_vm0, %v217_v14, -inf }
 0x10f   : > { %219 = vmax.xlane.f32.xlu1 %v218_v15 }
 0x111   : > { %v214_v16 = vpop.f32.mrf.mxu0 }
 0x117   : > { %v293_v17 = vpop.f32.mrf.mxu3 }
 0x118   : > { %v297_v18 = vmul.f32 0.35355338, %v293_v17 }
 0x11a   : > { %v298_v19 = vadd.f32 %v297_v18, %v714_v12 }
 0x11c   : > { %v299_v20 = vsel %vm196_vm0, %v298_v19, -inf }
 0x11d   : > { %300 = vmax.xlane.f32.xlu2 %v299_v20 }
 0x11f   : > { %v295_v21 = vpop.f32.mrf.mxu3 }
 0x131   : > { %v374_v47 = vpop.f32.mrf.mxu0 }
 0x132   : > { %v378_v49 = vmul.f32 0.35355338, %v374_v47 }
 0x134   : > { %v379_v50 = vadd.f32 %v378_v49, %v714_v12 }
 0x136   : > { %v380_v51 = vsel %vm196_vm0, %v379_v50, -inf }
 0x139   : > { %v376_v52 = vpop.f32.mrf.mxu0 }
 0x182   : > { %v220_v23 = vpop.xlane.xlu1 %219 }
 0x183   : > { %v221_v24 = vsub.f32 %v217_v14, %v220_v23 }
 0x185   : > { %v222_v25 = vmul.f32 1.442695, %v221_v24 }
 0x187   : > { %629 = vpow2.f32 %v222_v25 }
 0x18d   : > { %v630_v27 = vpop.eup %629 }
 0x18e   : > { %v224_v29 = vsel %vm196_vm0, %v630_v27, 0.0 }
 0x18f   : > { %225 = vadd.xlane.f32.xlu2 %v224_v29 }
 0x190   : > { %v301_v31 = vpop.xlane.xlu2 %300 }
 0x191   : > { %v302_v32 = vsub.f32 %v298_v19, %v301_v31 }
 0x193   : > { %v303_v33 = vmul.f32 1.442695, %v302_v32 }
 0x195   : > { %631 = vpow2.f32 %v303_v33 }
 0x19b   : > { %v632_v35 = vpop.eup %631 }
 0x19c   : > { %v305_v36 = vsel %vm196_vm0, %v632_v35, 0.0 }
 0x19d   : > { %306 = vadd.xlane.f32.xlu2 %v305_v36 }
 0x1b5   : > { %438 = vrot.lane.b32.xlu2 %v699_v1, %s662_s26 }
 0x1de   : > { %381 = vmax.xlane.f32.xlu2 %v380_v51 }
 0x1f6   : > { %473 = vrot.lane.b32.xlu2 %v699_v1, %s663_s7 }
 0x202   : > { %v226_v40 = vpop.xlane.xlu2 %225 }
 0x203   : > { %633 = vrcp.f32 %v226_v40 }
 0x209   : > { %v634_v41 = vpop.eup %633 }
 0x20a   : > { %v228_v42 = vmul.f32 %v634_v41, %v630_v27 }
 0x20c   : > { %v229_v43 = vpack.c.bf16 %v228_v42, %v228_v42 }
 0x20e   : > { %593 = vmatmul.msk.bf16.vlgmr.msra.gmra.mxu1 %vm196_vm0, %v229_v43 }
 0x20f   : > { %429 = vmatpush.bf16.msra.mxu1 %v420_v38 }
 0x210   : > { %v307_v44 = vpop.xlane.xlu2 %306 }
 0x211   : > { %635 = vrcp.f32 %v307_v44 }
 0x217   : > { %v636_v45 = vpop.eup %635 }
 0x218   : > { %v309_v46 = vmul.f32 %v636_v45, %v632_v35  ;;  %v439_v57 = vpop.permute.xlu2 %438  ;;  %v605_v35 = vld [vmem:[%s775_s1 + $0xc] sm:$0xf] }
 0x219   : > { %v444_v60 = vsel %vm196_vm0, %v439_v57, 0  ;;  %v501_v36 = vsel %vm235_vm2, %v605_v35, 0 }
 0x21a   : > { %v310_v48 = vpack.c.bf16 %v309_v46, %v309_v46 }
 0x21e   : > { %596 = vmatmul.msk.bf16.vlgmr.msrb.gmra.mxu1 %vm196_vm0, %v310_v48 }
 0x251   : > { %v382_v62 = vpop.xlane.xlu2 %381 }
 0x252   : > { %v383_v63 = vsub.f32 %v379_v50, %v382_v62 }
 0x254   : > { %v384_v0 = vmul.f32 1.442695, %v383_v63 }
 0x256   : > { %637 = vpow2.f32 %v384_v0 }
 0x259   : > { %v474_v25 = vpop.permute.xlu2 %473 }
 0x25c   : > { %v638_v4 = vpop.eup %637 }
 0x25d   : > { %v386_v5 = vsel %vm196_vm0, %v638_v4, 0.0 }
 0x25e   : > { %387 = vadd.xlane.f32.xlu0 %v386_v5 }
 0x28b   : > { %v248_v58 = vpop.f32.mrf.mxu1 }
 0x28c   : > { %v252_v59 = vpack.c.bf16 %v248_v58, %v248_v58 }
 0x28e   : > { %594 = vmatmul.msk.bf16.vlgmr.msra.gmra.mxu2 %vm196_vm0, %v252_v59 }
 0x28f   : > { %453 = vmatpush.bf16.xpose.msra.mxu2 %v444_v60 }
 0x293   : > { %v250_v61 = vpop.f32.mrf.mxu1 }
 0x29b   : > { %v328_v2 = vpop.f32.mrf.mxu1 }
 0x29c   : > { %v332_v3 = vpack.c.bf16 %v328_v2, %v328_v2 }
 0x29e   : > { %598 = vmatmul.msk.bf16.vlgmr.msrb.gmra.mxu2 %vm196_vm0, %v332_v3 }
 0x2a3   : > { %v330_v6 = vpop.f32.mrf.mxu1 }
 0x2ae   : > { %603 = vmatmul.msk.bf16.vlgmr.msra.gmra.mxu2 %vm196_vm0, %v437_v34 }
 0x2d1   : > { %v388_v30 = vpop.xlane.xlu0 %387 }
 0x311   : > { %v269_v7 = vpop.f32.mrf.mxu2 }
 0x312   : > { %v273_v10 = vadd.f32 %v269_v7, %v185_v9 }
 0x319   : > { %v271_v8 = vpop.f32.mrf.mxu2 }
 0x321   : > { %v350_v11 = vpop.f32.mrf.mxu2 }
 0x322   : > { %v354_v13 = vadd.f32 %v350_v11, %v273_v10 }
 0x329   : > { %v352_v14 = vpop.f32.mrf.mxu2 }
 0x331   : > { %v455_v15 = vpop.f32.mrf.mxu2 }
 0x332   : > { %v459_v16 = vmul.f32 0.35355338, %v455_v15 }
 0x334   : > { %v460_v17 = vadd.f32 %v459_v16, %v714_v12  ;;  %v479_v12 = vsel %vm235_vm2, %v474_v25, 0 }
 0x335   : > { %488 = vmatpush.bf16.msra.mxu0 %v479_v12 }
 0x336   : > { %v461_v18 = vsel %vm196_vm0, %v460_v17, -inf }
 0x337   : > { %462 = vmax.xlane.f32.xlu1 %v461_v18 }
 0x339   : > { %v457_v19 = vpop.f32.mrf.mxu2 }
 0x3aa   : > { %v463_v20 = vpop.xlane.xlu1 %462 }
 0x3ab   : > { %v464_v21 = vsub.f32 %v460_v17, %v463_v20 }
 0x3ad   : > { %v465_v22 = vmul.f32 1.442695, %v464_v21 }
 0x3af   : > { %639 = vpow2.f32 %v465_v22 }
 0x3b5   : > { %v640_v23 = vpop.eup %639 }
 0x3b6   : > { %v467_v24 = vsel %vm196_vm0, %v640_v23, 0.0 }
 0x3b7   : > { %468 = vadd.xlane.f32.xlu1 %v467_v24 }
 0x3d0   : > { %392 = vrot.lane.b32.xlu1 %v699_v1, %s664_s8 }
 0x42a   : > { %v469_v26 = vpop.xlane.xlu1 %468 }
 0x42b   : > { %641 = vrcp.f32 %v469_v26 }
 0x42c   : > { %643 = vrcp.f32 %v388_v30 }
 0x431   : > { %v642_v27 = vpop.eup %641 }
 0x432   : > { %v471_v28 = vmul.f32 %v642_v27, %v640_v23  ;;  %v644_v31 = vpop.eup %643 }
 0x433   : > { %v390_v32 = vmul.f32 %v644_v31, %v638_v4 }
 0x434   : > { %v472_v29 = vpack.c.bf16 %v471_v28, %v471_v28 }
 0x435   : > { %v391_v1 = vpack.c.bf16 %v390_v32, %v390_v32 }
 0x436   : > { %604 = vmatmul.msk.bf16.vlgmr.msra.gmra.mxu0 %vm196_vm0, %v472_v29 }
 0x442   : > { %v393_v33 = vpop.permute.xlu1 %392 }
 0x443   : > { %v398_v34 = vsel %vm235_vm2, %v393_v33, 0 }
 0x444   : > { %407 = vmatpush.bf16.msrb.mxu3 %v398_v34 }
 0x447   : > { %600 = vmatmul.msk.bf16.vlgmr.msrb.gmra.mxu3 %vm196_vm0, %v391_v1 }
 0x448   : > { %510 = vmatpush.bf16.msra.mxu3 %v501_v36 }
 0x4b3   : > { %v490_v39 = vpop.f32.mrf.mxu0 }
 0x4b4   : > { %v494_v40 = vpack.c.bf16 %v490_v39, %v490_v39 }
 0x4b6   : > { %606 = vmatmul.msk.bf16.vlgmr.msra.gmra.mxu3 %vm196_vm0, %v494_v40 }
 0x4bb   : > { %v492_v41 = vpop.f32.mrf.mxu0 }
 0x4ca   : > { %v409_v42 = vpop.f32.mrf.mxu3 }
 0x4cb   : > { %v413_v43 = vpack.c.bf16 %v409_v42, %v409_v42 }
 0x4cd   : > { %602 = vmatmul.msk.bf16.vlgmr.msra.gmra.mxu1 %vm196_vm0, %v413_v43 }
 0x4d2   : > { %v411_v44 = vpop.f32.mrf.mxu3 }
 0x539   : > { %v512_v45 = vpop.f32.mrf.mxu3 }
 0x541   : > { %v514_v46 = vpop.f32.mrf.mxu3 }
 0x54a   : > { %v431_v47 = vpop.f32.mrf.mxu1 }
 0x54b   : > { %v435_v48 = vadd.f32 %v431_v47, %v354_v13 }
 0x54d   : > { %v516_v49 = vadd.f32 %v512_v45, %v435_v48 }
 0x54f   : > { %518 = vst.msk [vmem:[%s182_s17] sm:$0xff] %vm517_vm3, %v516_v49 }
 0x552   : > { %v433_v50 = vpop.f32.mrf.mxu1 }
 0x553 PF: > { %s13_s12 = sadd.s32 1, %s651_s12  }
 0x554   : > { %p10_p4 = scmp.ge.s32.totalorder %s13_s12, 4  }
 0x556   :  { %12 = sbr.rel (!%p10_p4) target bundleno = 1 (0x1), region = 68 }

// kernel: fwd.29
= control target key start
LH: loop header
LB: loop body
LE: loop exit
PB: predicated region body
PF: predicated region fallthrough
CT: control target
= control target key end

     0   :  { %vm20_vm0 = vcmask 130048   ;;  %v140_v1 = vmov 0.0   ;;  %s188_s0 = inlined_call_operand.vmem [shape: f32[16,32], index: 0, kind: input, shape index: {}]   ;;  %s189_s1 = inlined_call_operand.vmem [shape: bf16[32,16], index: 1, kind: input, shape index: {}]   ;;  %s190_s2 = inlined_call_operand.vmem [shape: f32[1,16], index: 2, kind: input, shape index: {}]   ;;  %s191_s3 = inlined_call_operand.hbm [shape: f32[16,16], index: 3, kind: output, shape index: {}]  }
   0x1   :  { %v108_v0 = vld [vmem:[%s189_s1 + $0x8] sm:$0xff]  ;;  %21 = vst.msk [vmem:[#allocation2] sm:$0xff] %vm20_vm0, %v140_v1 }
   0x2   :  { %8 = vsyncpa [#allocation4], 0  ;;  %54 = vmatpush.bf16.msra.mxu0 %v108_v0  ;;  %v107_v2 = vld [vmem:[%s189_s1] sm:$0xff]  ;;  %v26_v4 = vld [vmem:[%s188_s0 + $0x8] sm:$0xff]  ;;  %22 = vst.msk [vmem:[#allocation2 + $0x8] sm:$0xff] %vm20_vm0, %v140_v1  ;;  %vm44_vm1 = vcmask 261120  }
   0x3   :  { %v25_v3 = vld [vmem:[%s188_s0] sm:$0xff]  ;;  %s141_s0 = smov [#allocation3]   ;;  %s86_s24 = sshll.u32 %s191_s3, 4  ;;  %s87_s24 = int_to_ptr.hbm [resolvable:$true] %s86_s24 }
   0x4   :  { %v27_v5 = vpack.c.bf16 %v26_v4, %v25_v3  ;;  %v113_v10 = vld [vmem:[%s190_s2] ss:$0 sm:$0xff]  ;;  %s84_s21 = sshll.u32 %s141_s0, 4  ;;  %s142_s2 = smov 128   ;;  %s85_s21 = int_to_ptr.vmem [resolvable:$true] %s84_s21 }
   0x5   :  { %s143_s25 = smov 8  }
   0x6   :  { %55 = vmatpush.bf16.msra.mxu0 %v107_v2 }
   0x8   :  { %v23_v6 = vld [vmem:[#allocation2] sm:$0xff] }
   0x9   :  { %106 = vmatmul.msk.bf16.vlgmr.msra.gmra.mxu0 %vm44_vm1, %v27_v5  ;;  %v24_v9 = vld [vmem:[#allocation2 + $0x8] sm:$0xff] }
  0x86   :  { %v57_v7 = vpop.f32.mrf.mxu0 }
  0x87   :  { %v62_v8 = vadd.f32 %v57_v7, %v23_v6 }
  0x89   :  { %65 = vst.msk [vmem:[#allocation2] sm:$0xff] %vm20_vm0, %v62_v8 }
  0x8e   :  { %v59_v11 = vpop.f32.mrf.mxu0 }
  0x8f   :  { %v63_v12 = vadd.f32 %v59_v11, %v24_v9 }
  0x90   :  { %v70_v13 = vld [vmem:[#allocation2] sm:$0xff] }
  0x91   :  { %66 = vst.msk [vmem:[#allocation2 + $0x8] sm:$0xff] %vm20_vm0, %v63_v12  ;;  %v76_v14 = vadd.f32 %v113_v10, %v70_v13 }
  0x93   :  { %78 = vst.msk [vmem:[#allocation3] sm:$0xff] %vm20_vm0, %v76_v14 }
  0x98   :  { %v71_v15 = vld [vmem:[#allocation2 + $0x8] sm:$0xff] }
  0x99   :  { %v77_v16 = vadd.f32 %v113_v10, %v71_v15 }
  0x9b   :  { %79 = vst.msk [vmem:[#allocation3 + $0x8] sm:$0xff] %vm20_vm0, %v77_v16 }
  0x9c   :  { %92 = dma.vmem_to_hbm [thread:$0]  %s85_s21, 256, %s87_s24, [#allocation4], %s142_s2, %s142_s2, %s143_s25  }
  0x9d   :  { %138 = dma.done.wait [#allocation4], 256  }
  0x9e   :  { %139 = vsyncadd [#allocation4], 4294967040 }
  0x9f   :  { %97 = vsyncpa [#allocation4], 1 }

// kernel: fwd.23
= control target key start
LH: loop header
LB: loop body
LE: loop exit
PB: predicated region body
PF: predicated region fallthrough
CT: control target
= control target key end

     0   :  { %s856_s24 = smov 0   ;;  %s947_s0 = inlined_call_operand.vmem [shape: f32[2,8,32], index: 0, kind: input, shape index: {}]   ;;  %s948_s1 = inlined_call_operand.vmem [shape: f32[2,8,32], index: 1, kind: input, shape index: {}]   ;;  %s949_s2 = inlined_call_operand.vmem [shape: f32[1,32], index: 2, kind: input, shape index: {}]   ;;  %s950_s3 = inlined_call_operand.vmem [shape: f32[1,32], index: 3, kind: input, shape index: {}]   ;;  %s951_s4 = inlined_call_operand.vmem [shape: f32[1,32], index: 4, kind: input, shape index: {}]   ;;  %s952_s5 = inlined_call_operand.vmem [shape: f32[1,32], index: 5, kind: input, shape index: {}]   ;;  %s953_s6 = inlined_call_operand.vmem [shape: bf16[4,8,32], index: 6, kind: input, shape index: {}]   ;;  %s954_s7 = inlined_call_operand.vmem [shape: f32[2,8,32], index: 7, kind: output, shape index: {}]  }
   0x1 LB: > { %s741_s25 = sadd.s32 4294967295, %s810_s24   ;;  %p745_p0 = scmp.ge.s32.totalorder %s810_s24, 1  ;;  %s810_s24 = sphi %s856_s24, %s17_s24  }
   0x2   : > { %p245_p1 = scmp.lt.s32.totalorder %s810_s24, 3 }
   0x4   : > { %p246_p2 = pnand %p745_p0, %p245_p1 }
   0x5   : > { %p279_p3 = scmp.lt.s32.totalorder (!%p246_p2), %s741_s25, 1  ;;  %s813_s16 = smov (!%p246_p2), 120  }
   0x6   : > { %249 = sbr.rel (%p246_p2) target bundleno = 1576 (0x628), region = 48  ;;  %s814_s19 = smov (!%p246_p2), 104  }
   0x7   : > { %s815_s20 = smov (!%p246_p2), 112  }
   0xb   : > { %s956_s25 = smov (!%p279_p3, %s741_s25), 1  ;;  %vm295_vm0 = vcmask 261120   ;;  %v812_v4 = vmov 32.0   ;;  %v778_v35 = vld [vmem:[%s951_s4] ss:$0 sm:$0xff]  ;;  %vm368_vm7 = vcmask 64512  }
   0xc   : > { %s864_s26 = sshll.u32 %s956_s25, 3  ;;  %782 = vrcp.f32 %v812_v4  ;;  %v779_v39 = vld [vmem:[%s952_s5] ss:$0 sm:$0xff]  ;;  %vm404_vm8 = vcmask 1043456  }
   0xd   : > { %s286_s29 = scalar_lea.vmem %s948_s1, %s864_s26  ;;  %s282_s9 = scalar_lea.vmem %s947_s0, %s864_s26  ;;  %v780_v46 = vld [vmem:[%s949_s2] ss:$0 sm:$0xff] }
   0xe   : > { %v333_v0 = vld [vmem:[%s286_s29] sm:$0xff]  ;;  %s290_s10 = scalar_lea.vmem %s954_s7, %s864_s26 }
   0xf   : > { %v336_v1 = vsel %vm295_vm0, %v333_v0, 0.0  ;;  %v875_v2 = vld [vmem:[%s282_s9] sm:$0xff] }
  0x10   : > { %337 = vadd.xlane.f32.xlu0 %v336_v1  ;;  %v296_v3 = vsel %vm295_vm0, %v875_v2, 0.0  ;;  %v781_v51 = vld [vmem:[%s950_s3] ss:$0 sm:$0xff] }
  0x12   : > { %v783_v5 = vpop.eup %782 }
  0x13   : > { %v300_v6 = vmul.f32 32.0, %v783_v5  ;;  %vm304_vm1 = vweird.f32 %v783_v5 }
  0x15   : > { %v301_v7 = vsub.f32 1.0, %v300_v6 }
  0x17   : > { %v302_v8 = vmul.f32 %v783_v5, %v301_v7 }
  0x18   : > { %297 = vadd.xlane.f32.xlu0 %v296_v3 }
  0x19   : > { %v303_v9 = vadd.f32 %v783_v5, %v302_v8 }
  0x1b   : > { %v305_v10 = vsel %vm304_vm1, %v783_v5, %v303_v9 }
  0x83   : > { %v338_v11 = vpop.xlane.xlu0 %337 }
  0x84   : > { %v339_v12 = vmul.f32 %v338_v11, %v305_v10 }
  0x86   : > { %v340_v13 = vsub.f32 %v333_v0, %v339_v12 }
  0x88   : > { %v341_v14 = vmul.f32 %v340_v13, %v340_v13 }
  0x8a   : > { %v342_v15 = vsel %vm295_vm0, %v341_v14, 0.0 }
  0x8b   : > { %343 = vadd.xlane.f32.xlu1 %v342_v15  ;;  %v298_v16 = vpop.xlane.xlu0 %297 }
  0x8c   : > { %v306_v17 = vmul.f32 %v305_v10, %v298_v16 }
  0x8e   : > { %v307_v18 = vsub.f32 %v875_v2, %v306_v17 }
  0x90   : > { %v308_v19 = vmul.f32 %v307_v18, %v307_v18 }
  0x92   : > { %v309_v20 = vsel %vm295_vm0, %v308_v19, 0.0 }
  0x93   : > { %310 = vadd.xlane.f32.xlu1 %v309_v20 }
  0xfe   : > { %v344_v21 = vpop.xlane.xlu1 %343 }
  0xff   : > { %v345_v22 = vmul.f32 %v344_v21, %v305_v10 }
 0x101   : > { %v346_v23 = vadd.f32 1e-05, %v345_v22 }
 0x103   : > { %784 = vrsqrt.f32 %v346_v23  ;;  %vm353_vm3 = vweird.f32 %v346_v23 }
 0x106   : > { %v311_v24 = vpop.xlane.xlu1 %310 }
 0x107   : > { %v312_v25 = vmul.f32 %v311_v24, %v305_v10 }
 0x109   : > { %v785_v26 = vpop.eup %784  ;;  %v313_v27 = vadd.f32 1e-05, %v312_v25 }
 0x10a   : > { %v348_v28 = vmul.f32 %v785_v26, %v346_v23  ;;  %vm354_vm2 = vweird.f32 %v785_v26  ;;  %v754_v23 = vld [vmem:[%s953_s6 + $0x4] sm:$0xf] }
 0x10b   : > { %786 = vrsqrt.f32 %v313_v27  ;;  %vm355_vm4 = vmor %vm353_vm3, %vm354_vm2  ;;  %vm320_vm6 = vweird.f32 %v313_v27  ;;  %v505_v24 = vsel %vm404_vm8, %v754_v23, 0 }
 0x10c   : > { %v349_v29 = vmul.f32 %v785_v26, %v348_v28 }
 0x10e   : > { %v350_v30 = vmul.f32 0.5, %v349_v29 }
 0x110   : > { %v351_v31 = vsub.f32 1.5, %v350_v30 }
 0x111   : > { %v787_v32 = vpop.eup %786 }
 0x112   : > { %v352_v33 = vmul.f32 %v785_v26, %v351_v31  ;;  %v315_v34 = vmul.f32 %v787_v32, %v313_v27  ;;  %vm321_vm5 = vweird.f32 %v787_v32 }
 0x113   : > { %vm322_vm9 = vmor %vm320_vm6, %vm321_vm5 }
 0x114   : > { %v356_v36 = vsel %vm355_vm4, %v785_v26, %v352_v33  ;;  %v316_v37 = vmul.f32 %v787_v32, %v315_v34 }
 0x115   : > { %v357_v38 = vmul.f32 %v356_v36, %v340_v13 }
 0x116   : > { %v317_v40 = vmul.f32 0.5, %v316_v37 }
 0x117   : > { %v361_v41 = vmul.f32 %v778_v35, %v357_v38 }
 0x118   : > { %v318_v42 = vsub.f32 1.5, %v317_v40 }
 0x119   : > { %v365_v43 = vadd.f32 %v779_v39, %v361_v41 }
 0x11a   : > { %v319_v44 = vmul.f32 %v787_v32, %v318_v42 }
 0x11b   : > { %v367_v45 = vpack.c.bf16 %v365_v43, %v365_v43 }
 0x11c   : > { %v323_v47 = vsel %vm322_vm9, %v787_v32, %v319_v44 }
 0x11d   : > { %v324_v48 = vmul.f32 %v323_v47, %v307_v18  ;;  %446 = vrot.lane.b32.xlu2 %v367_v45, %s813_s16  ;;  %v373_v49 = vsel %vm368_vm7, %v367_v45, 0  ;;  %v405_v50 = vsel %vm404_vm8, %v367_v45, 0  ;;  %v421_v18 = vld [vmem:[%s953_s6] sm:$0xf] }
 0x11e   : > { %382 = vmatpush.bf16.xpose.msra.mxu0 %v373_v49  ;;  %414 = vmatpush.bf16.msra.mxu1 %v405_v50  ;;  %v426_v19 = vsel %vm404_vm8, %v421_v18, 0 }
 0x11f   : > { %v328_v52 = vmul.f32 %v780_v46, %v324_v48  ;;  %435 = vmatpush.bf16.msra.mxu2 %v426_v19 }
 0x121   : > { %v332_v53 = vadd.f32 %v781_v51, %v328_v52 }
 0x123   : > { %v366_v54 = vpack.c.bf16 %v332_v53, %v332_v53  ;;  %514 = vmatpush.bf16.msrb.mxu2 %v505_v24 }
 0x125   : > { %443 = vrot.lane.b32.xlu2 %v366_v54, %s813_s16  ;;  %749 = vmatmul.msk.bf16.vlgmr.msra.gmra.mxu0 %vm368_vm7, %v366_v54 }
 0x177   : > { %v447_v55 = vpop.permute.xlu2 %446 }
 0x178   : > { %v452_v56 = vsel %vm368_vm7, %v447_v55, 0  ;;  %v483_v57 = vsel %vm404_vm8, %v447_v55, 0 }
 0x179   : > { %461 = vmatpush.bf16.xpose.msra.mxu3 %v452_v56  ;;  %492 = vmatpush.bf16.msrb.mxu1 %v483_v57 }
 0x17f   : > { %v444_v58 = vpop.permute.xlu2 %443 }
 0x180   : > { %752 = vmatmul.msk.bf16.vlgmr.msra.gmra.mxu3 %vm368_vm7, %v444_v58 }
 0x1a2   : > { %v384_v59 = vpop.f32.mrf.mxu0 }
 0x1a3   : > { %v388_v60 = vmul.f32 0.35355338, %v384_v59 }
 0x1a5   : > { %v389_v61 = vsel %vm368_vm7, %v388_v60, -inf }
 0x1a6   : > { %390 = vmax.xlane.f32.xlu0 %v389_v61 }
 0x1aa   : > { %v386_v62 = vpop.f32.mrf.mxu0 }
 0x203   : > { %v463_v63 = vpop.f32.mrf.mxu3 }
 0x204   : > { %v467_v0 = vmul.f32 0.35355338, %v463_v63 }
 0x206   : > { %v468_v1 = vsel %vm368_vm7, %v467_v0, -inf }
 0x207   : > { %469 = vmax.xlane.f32.xlu1 %v468_v1 }
 0x20b   : > { %v465_v3 = vpop.f32.mrf.mxu3 }
 0x219   : > { %v391_v4 = vpop.xlane.xlu0 %390 }
 0x21a   : > { %v392_v5 = vsub.f32 %v388_v60, %v391_v4  ;;  %v758_v4 = vld [vmem:[%s953_s6 + $0x8] sm:$0xf] }
 0x21c   : > { %v393_v6 = vmul.f32 1.442695, %v392_v5  ;;  %v582_v5 = vsel %vm404_vm8, %v758_v4, 0 }
 0x21e   : > { %788 = vpow2.f32 %v393_v6  ;;  %v762_v6 = vld [vmem:[%s953_s6 + $0xc] sm:$0xf] }
 0x220   : > { %600 = vrot.lane.b32.xlu1 %v367_v45, %s814_s19 }
 0x224   : > { %v789_v7 = vpop.eup %788 }
 0x225   : > { %v395_v8 = vsel %vm368_vm7, %v789_v7, 0.0 }
 0x226   : > { %396 = vadd.xlane.f32.xlu2 %v395_v8 }
 0x228   : > { %598 = vrot.lane.b32.xlu1 %v366_v54, %s814_s19 }
 0x27a   : > { %v470_v9 = vpop.xlane.xlu1 %469 }
 0x27b   : > { %v471_v10 = vsub.f32 %v467_v0, %v470_v9 }
 0x27d   : > { %v472_v11 = vmul.f32 1.442695, %v471_v10 }
 0x27f   : > { %790 = vpow2.f32 %v472_v11 }
 0x285   : > { %v791_v12 = vpop.eup %790 }
 0x286   : > { %v474_v13 = vsel %vm368_vm7, %v791_v12, 0.0 }
 0x287   : > { %475 = vadd.xlane.f32.xlu0 %v474_v13 }
 0x292   : > { %v601_v26 = vpop.permute.xlu1 %600 }
 0x293   : > { %v637_v30 = vsel %vm404_vm8, %v601_v26, 0  ;;  %v606_v34 = vsel %vm368_vm7, %v601_v26, 0 }
 0x299   : > { %v397_v14 = vpop.xlane.xlu2 %396 }
 0x29a   : > { %792 = vrcp.f32 %v397_v14  ;;  %v599_v41 = vpop.permute.xlu1 %598 }
 0x29b   : > { %523 = vrot.lane.b32.xlu0 %v367_v45, %s815_s20 }
 0x2a0   : > { %v793_v15 = vpop.eup %792 }
 0x2a1   : > { %v399_v16 = vmul.f32 %v793_v15, %v789_v7  ;;  %v659_v7 = vsel %vm404_vm8, %v762_v6, 0 }
 0x2a3   : > { %521 = vrot.lane.b32.xlu0 %v366_v54, %s815_s20  ;;  %v400_v17 = vpack.c.bf16 %v399_v16, %v399_v16 }
 0x2a5   : > { %750 = vmatmul.msk.bf16.vlgmr.msra.gmra.mxu1 %vm368_vm7, %v400_v17 }
 0x2a6   : > { %591 = vmatpush.bf16.msra.mxu1 %v582_v5 }
 0x2fa   : > { %v476_v20 = vpop.xlane.xlu0 %475 }
 0x2fb   : > { %794 = vrcp.f32 %v476_v20 }
 0x301   : > { %v795_v21 = vpop.eup %794 }
 0x302   : > { %v478_v22 = vmul.f32 %v795_v21, %v791_v12 }
 0x304   : > { %v479_v25 = vpack.c.bf16 %v478_v22, %v478_v22 }
 0x306   : > { %753 = vmatmul.msk.bf16.vlgmr.msrb.gmra.mxu1 %vm368_vm7, %v479_v25 }
 0x30d   : > { %v524_v27 = vpop.permute.xlu0 %523 }
 0x30e   : > { %v529_v28 = vsel %vm368_vm7, %v524_v27, 0  ;;  %v560_v29 = vsel %vm404_vm8, %v524_v27, 0 }
 0x30f   : > { %538 = vmatpush.bf16.xpose.msrb.mxu0 %v529_v28  ;;  %569 = vmatpush.bf16.msrb.mxu3 %v560_v29 }
 0x313   : > { %668 = vmatpush.bf16.msra.mxu3 %v659_v7 }
 0x315   : > { %v522_v31 = vpop.permute.xlu0 %521 }
 0x316   : > { %756 = vmatmul.msk.bf16.vlgmr.msrb.gmra.mxu0 %vm368_vm7, %v522_v31 }
 0x317   : > { %646 = vmatpush.bf16.msra.mxu0 %v637_v30 }
 0x322   : > { %v416_v32 = vpop.f32.mrf.mxu1 }
 0x323   : > { %v420_v33 = vpack.c.bf16 %v416_v32, %v416_v32 }
 0x325   : > { %751 = vmatmul.msk.bf16.vlgmr.msra.gmra.mxu2 %vm368_vm7, %v420_v33 }
 0x326   : > { %615 = vmatpush.bf16.xpose.msra.mxu2 %v606_v34 }
 0x32a   : > { %v418_v35 = vpop.f32.mrf.mxu1 }
 0x383   : > { %v494_v36 = vpop.f32.mrf.mxu1 }
 0x384   : > { %v498_v37 = vpack.c.bf16 %v494_v36, %v494_v36 }
 0x386   : > { %755 = vmatmul.msk.bf16.vlgmr.msrb.gmra.mxu2 %vm368_vm7, %v498_v37 }
 0x38b   : > { %v496_v38 = vpop.f32.mrf.mxu1 }
 0x393   : > { %v540_v39 = vpop.f32.mrf.mxu0 }
 0x394   : > { %v544_v40 = vmul.f32 0.35355338, %v540_v39 }
 0x396   : > { %760 = vmatmul.msk.bf16.vlgmr.msra.gmra.mxu2 %vm368_vm7, %v599_v41  ;;  %v545_v42 = vsel %vm368_vm7, %v544_v40, -inf }
 0x397   : > { %546 = vmax.xlane.f32.xlu1 %v545_v42 }
 0x39b   : > { %v542_v43 = vpop.f32.mrf.mxu0 }
 0x3a8   : > { %v437_v44 = vpop.f32.mrf.mxu2 }
 0x3a9   : > { %v441_v46 = vadd.f32 %v437_v44, %v875_v2 }
 0x3b0   : > { %v439_v45 = vpop.f32.mrf.mxu2 }
 0x409   : > { %v516_v47 = vpop.f32.mrf.mxu2 }
 0x40a   : > { %v520_v48 = vadd.f32 %v516_v47, %v441_v46  ;;  %v547_v49 = vpop.xlane.xlu1 %546 }
 0x40b   : > { %v548_v50 = vsub.f32 %v544_v40, %v547_v49 }
 0x40d   : > { %v549_v51 = vmul.f32 1.442695, %v548_v50 }
 0x40f   : > { %796 = vpow2.f32 %v549_v51 }
 0x411   : > { %v518_v52 = vpop.f32.mrf.mxu2 }
 0x415   : > { %v797_v53 = vpop.eup %796 }
 0x416   : > { %v551_v54 = vsel %vm368_vm7, %v797_v53, 0.0 }
 0x417   : > { %552 = vadd.xlane.f32.xlu0 %v551_v54 }
 0x419   : > { %v617_v55 = vpop.f32.mrf.mxu2 }
 0x41a   : > { %v621_v56 = vmul.f32 0.35355338, %v617_v55 }
 0x41c   : > { %v622_v57 = vsel %vm368_vm7, %v621_v56, -inf }
 0x41d   : > { %623 = vmax.xlane.f32.xlu2 %v622_v57 }
 0x421   : > { %v619_v58 = vpop.f32.mrf.mxu2 }
 0x48a   : > { %v553_v59 = vpop.xlane.xlu0 %552 }
 0x48b   : > { %798 = vrcp.f32 %v553_v59 }
 0x490   : > { %v624_v2 = vpop.xlane.xlu2 %623 }
 0x491   : > { %v799_v60 = vpop.eup %798  ;;  %v625_v61 = vsub.f32 %v621_v56, %v624_v2 }
 0x492   : > { %v555_v62 = vmul.f32 %v799_v60, %v797_v53 }
 0x493   : > { %v626_v63 = vmul.f32 1.442695, %v625_v61 }
 0x494   : > { %v556_v0 = vpack.c.bf16 %v555_v62, %v555_v62 }
 0x495   : > { %800 = vpow2.f32 %v626_v63 }
 0x496   : > { %757 = vmatmul.msk.bf16.vlgmr.msrb.gmra.mxu3 %vm368_vm7, %v556_v0 }
 0x49b   : > { %v801_v1 = vpop.eup %800 }
 0x49c   : > { %v628_v3 = vsel %vm368_vm7, %v801_v1, 0.0 }
 0x49d   : > { %629 = vadd.xlane.f32.xlu2 %v628_v3 }
 0x510   : > { %v630_v8 = vpop.xlane.xlu2 %629 }
 0x511   : > { %802 = vrcp.f32 %v630_v8 }
 0x517   : > { %v803_v9 = vpop.eup %802 }
 0x518   : > { %v632_v10 = vmul.f32 %v803_v9, %v801_v1 }
 0x519   : > { %v571_v11 = vpop.f32.mrf.mxu3 }
 0x51a   : > { %v633_v12 = vpack.c.bf16 %v632_v10, %v632_v10  ;;  %v575_v13 = vpack.c.bf16 %v571_v11, %v571_v11 }
 0x51c   : > { %759 = vmatmul.msk.bf16.vlgmr.msra.gmra.mxu1 %vm368_vm7, %v575_v13  ;;  %761 = vmatmul.msk.bf16.vlgmr.msra.gmra.mxu0 %vm368_vm7, %v633_v12 }
 0x521   : > { %v573_v14 = vpop.f32.mrf.mxu3 }
 0x599   : > { %v593_v15 = vpop.f32.mrf.mxu1  ;;  %v648_v16 = vpop.f32.mrf.mxu0 }
 0x59a   : > { %v597_v17 = vadd.f32 %v593_v15, %v520_v48  ;;  %v652_v18 = vpack.c.bf16 %v648_v16, %v648_v16 }
 0x59c   : > { %763 = vmatmul.msk.bf16.vlgmr.msra.gmra.mxu3 %vm368_vm7, %v652_v18 }
 0x5a1   : > { %v595_v19 = vpop.f32.mrf.mxu1  ;;  %v650_v20 = vpop.f32.mrf.mxu0 }
 0x61f   : > { %v670_v21 = vpop.f32.mrf.mxu3 }
 0x620   : > { %v674_v22 = vadd.f32 %v670_v21, %v597_v17 }
 0x622   : > { %675 = vst.msk [vmem:[%s290_s10] sm:$0xff] %vm295_vm0, %v674_v22 }
 0x627   : > { %v672_v23 = vpop.f32.mrf.mxu3 }
 0x628 PF: > { %s17_s24 = sadd.s32 1, %s810_s24  }
 0x629   : > { %p14_p4 = scmp.ge.s32.totalorder %s17_s24, 4  }
 0x62b   :  { %16 = sbr.rel (!%p14_p4) target bundleno = 1 (0x1), region = 84 }

</bundles_post_ra>
